<compile_context>
chip_gen: v5e
topology: v5e:2x2
jax: 0.10.0
libtpu: 0.0.40
codegen_flags: <defaults>
</compile_context>

<pallas_src>
import functools
import math

import jax
import jax.numpy as jnp
from jax.experimental import pallas as pl
from jax.experimental.pallas import tpu as pltpu


def _vmem_limit_bytes():
    """~3/4 of physical VMEM when discoverable; otherwise a value that is safe
    on every TPU generation (48 MiB < v7x's 64 MiB).  Ignored by interpret."""
    cap = None
    try:
        if jax.default_backend() == "tpu":
            cap = int(pltpu.get_tpu_info().vmem_capacity_bytes)
    except Exception:
        cap = None
    if not cap:
        return 48 * 1024 * 1024
    return int(min(cap * 3 // 4, 96 * 1024 * 1024))


def _choose_tile_hw(hw, batch, n_embed, c, d, vmem_limit, max_tile=2048):
    """Largest lane-dense tile of the H*W axis that (a) divides H*W, (b) fits a
    conservative VMEM budget (resident weights + double-buffered I/O blocks +
    live (N, tile) temporaries), and (c) when possible leaves >= 4 total grid
    steps so both v7x TensorCores get >= 2 steps each (keeps the z_q writeback
    hidden behind compute)."""
    cands = [t for t in range(128, min(max_tile, hw) + 1, 128) if hw % t == 0]
    if not cands:
        return hw                                   # tiny spatial extent
    # weights (double-buffered by the default pipeliner): W, b, e_hi, e_lo
    weights = 2 * (n_embed * c * 2 + n_embed * 4 + 2 * d * n_embed * 2)
    budget = int(vmem_limit * 0.7) - weights

    def est(t):   # double-buffered I/O blocks + ~6 live (N, t) f32 temporaries
        io = 2 * (c * t * 4 + d * t * 4 + 2 * t * 4)
        return io + 6 * n_embed * t * 4

    fits = [t for t in cands if est(t) <= budget] or [cands[0]]
    for t in sorted(fits, reverse=True):
        if batch * (hw // t) >= 4:
            return t
    return max(fits)


def _gumbel_quantize_kernel(seed_ref, x_ref, w_ref, b_ref, ehi_ref, elo_ref,
                            zq_ref, ind_ref, kl_ref, *, n_embed, hw, log_n):
    n = n_embed
    # ---- projection: logits = W @ x + b  -> (N, tile) f32 (bf16 MXU) --------
    x_bf16 = x_ref[...].astype(jnp.bfloat16)                      # (C, tile)
    logits = jnp.dot(w_ref[...], x_bf16,
                     preferred_element_type=jnp.float32) + b_ref[...]

    # ---- softmax pieces, shared by the KL and the categorical sample -------
    lmax = jnp.max(logits, axis=0, keepdims=True)                 # (1, tile)
    lm = logits - lmax
    el = jnp.exp(lm)                                              # (N, tile)
    s = jnp.sum(el, axis=0, keepdims=True)                        # (1, tile)

    # ---- portable counter-based RNG (murmur3 fmix32) -> U(0,1) -------------
    # TODO(synk): swap in pltpu.prng_random_bits when interpret-mode support is
    # not required (this hash is statistically fine for the forward sample).
    tile = logits.shape[1]
    base = (pl.program_id(0) * hw + pl.program_id(1) * tile).astype(jnp.uint32)
    seed = seed_ref[0].astype(jnp.uint32)
    row = jax.lax.broadcasted_iota(jnp.int32, logits.shape, 0).astype(jnp.uint32)
    col = jax.lax.broadcasted_iota(jnp.int32, logits.shape, 1).astype(jnp.uint32)
    h = (col + base) * jnp.uint32(0x9E3779B1) + row * jnp.uint32(0x85EBCA77) + seed
    h = h ^ (h >> 16)
    h = h * jnp.uint32(0x85EBCA6B)
    h = h ^ (h >> 13)
    h = h * jnp.uint32(0xC2B2AE35)
    h = h ^ (h >> 16)
    bits = (h >> 9).astype(jnp.int32)                             # [0, 2^23)
    u = (bits.astype(jnp.float32) + 0.5) * jnp.float32(1.0 / (1 << 23))

    # ---- exponential-race categorical sample == hard gumbel-softmax forward
    # argmax(logits + Gumbel) == argmax(exp(logits - max) / Exp(1)); the
    # temperature and the column-constant max shift do not change the argmax.
    score = el / (-jnp.log(u))                                    # (N, tile)
    iota_col = jax.lax.broadcasted_iota(jnp.int32, (n, 1), 0)     # (N, 1)
    smax = jnp.max(score, axis=0, keepdims=True)                  # (1, tile)
    idx = jnp.min(jnp.where(score == smax,
                            iota_col.astype(jnp.float32), jnp.float32(n)),
                  axis=0, keepdims=True).astype(jnp.int32)        # (1, tile)
    one_hot = (iota_col == idx).astype(jnp.bfloat16)              # (N, tile)

    # ---- z_q^T = embed^T @ one_hot: hi/lo bf16 split == ~f32-exact rows ----
    zq = jnp.dot(ehi_ref[...], one_hot, preferred_element_type=jnp.float32)
    zq = zq + jnp.dot(elo_ref[...], one_hot, preferred_element_type=jnp.float32)
    zq_ref[...] = zq.astype(zq_ref.dtype)

    # ---- per-pixel KL(q || uniform): sum_j q_j (log q_j + log N) -----------
    kl_ref[...] = (jnp.sum(el * lm, axis=0, keepdims=True) / s
                   - jnp.log(s) + log_n)
    ind_ref[...] = idx


def gumbel_quantize_forward(z, w_proj, b_proj, embed_w, noise_seed, *,
                            temp=1.0, kl_weight=0.0005, max_tile_hw=2048):
    """Forward pass of GumbelQuantize (remap=None, use_vqinterface=True,
    hard=True).  Note: the hard forward value is invariant to `temp`; the
    temperature only matters for the (soft) gradient path, which is not
    implemented here.

    z          : (B, C, H, W) float32 (NCHW, as in the PyTorch module)
    w_proj     : (N, C) 1x1-conv weight (squeezed), b_proj : (N,)
    embed_w    : (N, D) embedding table
    noise_seed : int; vary per call / training step or the sample noise repeats
    Returns (z_q, diff, (None, None, ind)) with z_q in NCHW float32.
    """
    assert temp > 0.0
    B, C, H, W = z.shape
    N, D = embed_w.shape
    HW = H * W
    vmem_limit = _vmem_limit_bytes()
    tile = _choose_tile_hw(HW, B, N, C, D, vmem_limit, max_tile_hw)
    assert HW % tile == 0
    n_hw = HW // tile

    x = z.reshape(B, C, HW)                         # free (contiguous) reshape
    w = w_proj.astype(jnp.bfloat16)                 # (N, C)
    b = b_proj.reshape(N, 1).astype(jnp.float32)    # (N, 1)
    e_t = jnp.transpose(embed_w, (1, 0)).astype(jnp.float32)   # (D, N), tiny
    e_hi = e_t.astype(jnp.bfloat16)
    e_lo = (e_t - e_hi.astype(jnp.float32)).astype(jnp.bfloat16)
    seed = jnp.asarray([noise_seed], dtype=jnp.int32)

    kernel = functools.partial(_gumbel_quantize_kernel, n_embed=int(N),
                               hw=int(HW), log_n=float(math.log(N)))

    # TODO(synk): add pipeline_mode=pl.Buffered(1) on the three weight specs
    # (v7x VMEM saving) once it is confirmed safe under interpret mode.
    zq, ind_row, kl_row = pl.pallas_call(
        kernel,
        out_shape=(
            jax.ShapeDtypeStruct((B, D, HW), jnp.float32),
            jax.ShapeDtypeStruct((B, 1, HW), jnp.int32),
            jax.ShapeDtypeStruct((B, 1, HW), jnp.float32),
        ),
        grid_spec=pltpu.PrefetchScalarGridSpec(
            num_scalar_prefetch=1,                  # RNG seed (SMEM scalar)
            grid=(B, n_hw),
            in_specs=[
                pl.BlockSpec((None, C, tile), lambda bi, i, sd: (bi, 0, i)),
                pl.BlockSpec((N, C), lambda bi, i, sd: (0, 0)),
                pl.BlockSpec((N, 1), lambda bi, i, sd: (0, 0)),
                pl.BlockSpec((D, N), lambda bi, i, sd: (0, 0)),
                pl.BlockSpec((D, N), lambda bi, i, sd: (0, 0)),
            ],
            out_specs=[
                pl.BlockSpec((None, D, tile), lambda bi, i, sd: (bi, 0, i)),
                pl.BlockSpec((None, 1, tile), lambda bi, i, sd: (bi, 0, i)),
                pl.BlockSpec((None, 1, tile), lambda bi, i, sd: (bi, 0, i)),
            ],
        ),
        compiler_params=pltpu.CompilerParams(
            dimension_semantics=("parallel", "parallel"),
            vmem_limit_bytes=vmem_limit),
    )(seed, x, w, b, e_hi, e_lo)

    z_q = zq.reshape(B, D, H, W)          # free reshape (already channel-first)
    ind = ind_row.reshape(B, H, W)
    diff = kl_weight * jnp.mean(kl_row)   # mean over B*H*W pixels
    # use_vqinterface=True, return_logits=False
    return z_q, diff, (None, None, ind)


if __name__ == "__main__":
    # Module hyperparameters (small, consistent with GumbelQuantize.__init__)
    num_hiddens = 32      # conv in-channels
    n_embed = 128         # codebook size (conv out-channels)
    embedding_dim = 64    # codebook entry dim
    B, H, W = 2, 16, 16   # HW = 256 -> tile 128, grid (2, 2) = 4 steps
    temp_init = 1.0
    kl_weight = 0.0005

    key = jax.random.PRNGKey(0)
    k_z, k_w, k_b, k_e = jax.random.split(key, 4)

    z = jax.random.normal(k_z, (B, num_hiddens, H, W), dtype=jnp.float32)
    w_proj = 0.1 * jax.random.normal(k_w, (n_embed, num_hiddens), dtype=jnp.float32)
    b_proj = 0.01 * jax.random.normal(k_b, (n_embed,), dtype=jnp.float32)
    embed_w = jax.random.normal(k_e, (n_embed, embedding_dim), dtype=jnp.float32)

    z_q, diff, (_, _, ind) = gumbel_quantize_forward(
        z, w_proj, b_proj, embed_w, noise_seed=1234,
        temp=temp_init, kl_weight=kl_weight)
    jax.block_until_ready((z_q, diff, ind))

    assert z_q.shape == (B, embedding_dim, H, W)
    assert ind.shape == (B, H, W)
    assert diff.shape == ()
    assert bool(jnp.all((ind >= 0) & (ind < n_embed)))
    assert bool(jnp.isfinite(diff))

    # Hard gumbel-softmax: every output pixel must be (near-exactly) the
    # codebook row selected by `ind` (hi/lo bf16 split keeps ~f32 accuracy).
    zq_pix = jnp.transpose(z_q, (0, 2, 3, 1)).reshape(-1, embedding_dim)
    gathered = embed_w[ind.reshape(-1)]
    assert float(jnp.max(jnp.abs(zq_pix - gathered))) < 5e-4

    # KL term vs. a pure-JAX reference on the same bf16-rounded operands.
    xr = z.astype(jnp.bfloat16).astype(jnp.float32)
    wr = w_proj.astype(jnp.bfloat16).astype(jnp.float32)
    ref_logits = jnp.einsum("nc,bchw->bnhw", wr, xr) + b_proj[None, :, None, None]
    ref_qy = jax.nn.softmax(ref_logits, axis=1)
    ref_diff = kl_weight * jnp.mean(
        jnp.sum(ref_qy * jnp.log(ref_qy * n_embed + 1e-10), axis=1))
    assert abs(float(diff) - float(ref_diff)) <= 1e-7 + 1e-2 * abs(float(ref_diff))

    print("KERNEL_OK")
</pallas_src>

<mosaic_0001>
module attributes {stable_mosaic.version = 11 : i64} {
  func.func @_gumbel_quantize_kernel(%arg0: i32, %arg1: i32, %arg2: memref<1xi32, #tpu.memory_space<smem>>, %arg3: memref<1x32x128xf32, #tpu.memory_space<vmem>>, %arg4: memref<128x32xbf16, #tpu.memory_space<vmem>>, %arg5: memref<128x1xf32, #tpu.memory_space<vmem>>, %arg6: memref<64x128xbf16, #tpu.memory_space<vmem>>, %arg7: memref<64x128xbf16, #tpu.memory_space<vmem>>, %arg8: memref<1x64x128xf32, #tpu.memory_space<vmem>>, %arg9: memref<1x1x128xi32, #tpu.memory_space<vmem>>, %arg10: memref<1x1x128xf32, #tpu.memory_space<vmem>>) attributes {dimension_semantics = [#tpu.dimension_semantics<parallel>, #tpu.dimension_semantics<parallel>], iteration_bounds = array<i64: 2, 2>, scalar_prefetch = 1 : i64, scratch_operands = 0 : i64, tpu.core_type = #tpu.core_type<tc>, window_params = [{transform_indices = @transform_0, window_bounds = array<i64: 1, 32, 128>}, {pipeline_mode = #tpu.pipeline_mode<synchronous>, transform_indices = @transform_1, window_bounds = array<i64: 128, 32>}, {pipeline_mode = #tpu.pipeline_mode<synchronous>, transform_indices = @transform_2, window_bounds = array<i64: 128, 1>}, {pipeline_mode = #tpu.pipeline_mode<synchronous>, transform_indices = @transform_3, window_bounds = array<i64: 64, 128>}, {pipeline_mode = #tpu.pipeline_mode<synchronous>, transform_indices = @transform_4, window_bounds = array<i64: 64, 128>}, {transform_indices = @transform_5, window_bounds = array<i64: 1, 64, 128>}, {transform_indices = @transform_6, window_bounds = array<i64: 1, 1, 128>}, {transform_indices = @transform_7, window_bounds = array<i64: 1, 1, 128>}]} {
    %c0 = arith.constant 0 : index
    %c0_0 = arith.constant 0 : index
    %c0_1 = arith.constant 0 : index
    %0 = vector.load %arg3[%c0, %c0_0, %c0_1] : memref<1x32x128xf32, #tpu.memory_space<vmem>>, vector<1x32x128xf32>
    %1 = vector.shape_cast %0 : vector<1x32x128xf32> to vector<32x128xf32>
    %2 = arith.truncf %1 : vector<32x128xf32> to vector<32x128xbf16>
    %c0_2 = arith.constant 0 : index
    %c0_3 = arith.constant 0 : index
    %3 = vector.load %arg4[%c0_2, %c0_3] : memref<128x32xbf16, #tpu.memory_space<vmem>>, vector<128x32xbf16>
    %cst = arith.constant dense<0.000000e+00> : vector<128x128xf32>
    %4 = tpu.matmul %3, %2, %cst {dimension_numbers = #tpu.dot_dimension_numbers<[1], [0], [0], [1], [0, 0, 1, 1], [], []>} : vector<128x32xbf16>, vector<32x128xbf16>, vector<128x128xf32> -> vector<128x128xf32>
    %c0_4 = arith.constant 0 : index
    %c0_5 = arith.constant 0 : index
    %5 = vector.load %arg5[%c0_4, %c0_5] : memref<128x1xf32, #tpu.memory_space<vmem>>, vector<128x1xf32>
    %6 = vector.broadcast %5 : vector<128x1xf32> to vector<128x128xf32>
    %7 = arith.addf %4, %6 : vector<128x128xf32>
    %cst_6 = arith.constant dense<0xFF800000> : vector<128xf32>
    %8 = vector.multi_reduction <maximumf>, %7, %cst_6 [0] : vector<128x128xf32> to vector<128xf32>
    %9 = vector.shape_cast %8 : vector<128xf32> to vector<1x128xf32>
    %10 = vector.broadcast %9 : vector<1x128xf32> to vector<128x128xf32>
    %11 = arith.subf %7, %10 : vector<128x128xf32>
    %12 = math.exp %11 : vector<128x128xf32>
    %cst_7 = arith.constant dense<0.000000e+00> : vector<128xf32>
    %13 = vector.multi_reduction <add>, %12, %cst_7 [0] : vector<128x128xf32> to vector<128xf32>
    %14 = vector.shape_cast %13 : vector<128xf32> to vector<1x128xf32>
    %c256_i32 = arith.constant 256 : i32
    %15 = arith.muli %arg0, %c256_i32 : i32
    %c128_i32 = arith.constant 128 : i32
    %16 = arith.muli %arg1, %c128_i32 : i32
    %17 = arith.addi %15, %16 : i32
    %c0_8 = arith.constant 0 : index
    %18 = memref.load %arg2[%c0_8] : memref<1xi32, #tpu.memory_space<smem>>
    %19 = tpu.iota {dimensions = array<i32: 0>} : vector<128x128xi32>
    %20 = tpu.iota {dimensions = array<i32: 1>} : vector<128x128xi32>
    %21 = vector.broadcast %17 : i32 to vector<128x128xi32>
    %22 = arith.addi %20, %21 : vector<128x128xi32>
    %c-1640531535_i32 = arith.constant -1640531535 : i32
    %23 = vector.broadcast %c-1640531535_i32 : i32 to vector<128x128xi32>
    %24 = arith.muli %22, %23 : vector<128x128xi32>
    %c-2048144777_i32 = arith.constant -2048144777 : i32
    %25 = vector.broadcast %c-2048144777_i32 : i32 to vector<128x128xi32>
    %26 = arith.muli %19, %25 : vector<128x128xi32>
    %27 = arith.addi %24, %26 : vector<128x128xi32>
    %28 = vector.broadcast %18 : i32 to vector<128x128xi32>
    %29 = arith.addi %27, %28 : vector<128x128xi32>
    %c16_i32 = arith.constant 16 : i32
    %30 = vector.broadcast %c16_i32 : i32 to vector<128x128xi32>
    %31 = arith.shrui %29, %30 : vector<128x128xi32>
    %32 = arith.xori %29, %31 : vector<128x128xi32>
    %c-2048144789_i32 = arith.constant -2048144789 : i32
    %33 = vector.broadcast %c-2048144789_i32 : i32 to vector<128x128xi32>
    %34 = arith.muli %32, %33 : vector<128x128xi32>
    %c13_i32 = arith.constant 13 : i32
    %35 = vector.broadcast %c13_i32 : i32 to vector<128x128xi32>
    %36 = arith.shrui %34, %35 : vector<128x128xi32>
    %37 = arith.xori %34, %36 : vector<128x128xi32>
    %c-1028477387_i32 = arith.constant -1028477387 : i32
    %38 = vector.broadcast %c-1028477387_i32 : i32 to vector<128x128xi32>
    %39 = arith.muli %37, %38 : vector<128x128xi32>
    %c16_i32_9 = arith.constant 16 : i32
    %40 = vector.broadcast %c16_i32_9 : i32 to vector<128x128xi32>
    %41 = arith.shrui %39, %40 : vector<128x128xi32>
    %42 = arith.xori %39, %41 : vector<128x128xi32>
    %c9_i32 = arith.constant 9 : i32
    %43 = vector.broadcast %c9_i32 : i32 to vector<128x128xi32>
    %44 = arith.shrui %42, %43 : vector<128x128xi32>
    %45 = arith.sitofp %44 : vector<128x128xi32> to vector<128x128xf32>
    %cst_10 = arith.constant 5.000000e-01 : f32
    %46 = vector.broadcast %cst_10 : f32 to vector<128x128xf32>
    %47 = arith.addf %45, %46 : vector<128x128xf32>
    %cst_11 = arith.constant 1.1920929E-7 : f32
    %48 = vector.broadcast %cst_11 : f32 to vector<128x128xf32>
    %49 = arith.mulf %47, %48 : vector<128x128xf32>
    %50 = math.log %49 : vector<128x128xf32>
    %cst_12 = arith.constant 0.000000e+00 : f32
    %51 = vector.broadcast %cst_12 : f32 to vector<128x128xf32>
    %52 = arith.subf %51, %50 : vector<128x128xf32>
    %53 = arith.divf %12, %52 : vector<128x128xf32>
    %54 = tpu.iota {dimensions = array<i32: 0>} : vector<128x1xi32>
    %cst_13 = arith.constant dense<0xFF800000> : vector<128xf32>
    %55 = vector.multi_reduction <maximumf>, %53, %cst_13 [0] : vector<128x128xf32> to vector<128xf32>
    %56 = vector.shape_cast %55 : vector<128xf32> to vector<1x128xf32>
    %57 = vector.broadcast %56 : vector<1x128xf32> to vector<128x128xf32>
    %58 = arith.cmpf oeq, %53, %57 : vector<128x128xf32>
    %59 = arith.sitofp %54 : vector<128x1xi32> to vector<128x1xf32>
    %cst_14 = arith.constant 1.280000e+02 : f32
    %60 = vector.shape_cast %59 : vector<128x1xf32> to vector<128x1xf32>
    %61 = vector.broadcast %60 : vector<128x1xf32> to vector<128x128xf32>
    %62 = vector.broadcast %cst_14 : f32 to vector<128x128xf32>
    %63 = arith.select %58, %61, %62 : vector<128x128xi1>, vector<128x128xf32>
    %cst_15 = arith.constant dense<0x7F800000> : vector<128xf32>
    %64 = vector.multi_reduction <minimumf>, %63, %cst_15 [0] : vector<128x128xf32> to vector<128xf32>
    %65 = vector.shape_cast %64 : vector<128xf32> to vector<1x128xf32>
    %66 = arith.fptosi %65 : vector<1x128xf32> to vector<1x128xi32>
    %67 = vector.broadcast %54 : vector<128x1xi32> to vector<128x128xi32>
    %68 = vector.broadcast %66 : vector<1x128xi32> to vector<128x128xi32>
    %69 = arith.cmpi eq, %67, %68 : vector<128x128xi32>
    %70 = arith.extui %69 : vector<128x128xi1> to vector<128x128xi32>
    %71 = arith.sitofp %70 : vector<128x128xi32> to vector<128x128xf32>
    %72 = arith.truncf %71 : vector<128x128xf32> to vector<128x128xbf16>
    %c0_16 = arith.constant 0 : index
    %c0_17 = arith.constant 0 : index
    %73 = vector.load %arg6[%c0_16, %c0_17] : memref<64x128xbf16, #tpu.memory_space<vmem>>, vector<64x128xbf16>
    %cst_18 = arith.constant dense<0.000000e+00> : vector<64x128xf32>
    %74 = tpu.matmul %73, %72, %cst_18 {dimension_numbers = #tpu.dot_dimension_numbers<[1], [0], [0], [1], [0, 0, 1, 1], [], []>} : vector<64x128xbf16>, vector<128x128xbf16>, vector<64x128xf32> -> vector<64x128xf32>
    %c0_19 = arith.constant 0 : index
    %c0_20 = arith.constant 0 : index
    %75 = vector.load %arg7[%c0_19, %c0_20] : memref<64x128xbf16, #tpu.memory_space<vmem>>, vector<64x128xbf16>
    %cst_21 = arith.constant dense<0.000000e+00> : vector<64x128xf32>
    %76 = tpu.matmul %75, %72, %cst_21 {dimension_numbers = #tpu.dot_dimension_numbers<[1], [0], [0], [1], [0, 0, 1, 1], [], []>} : vector<64x128xbf16>, vector<128x128xbf16>, vector<64x128xf32> -> vector<64x128xf32>
    %77 = arith.addf %74, %76 : vector<64x128xf32>
    %c0_22 = arith.constant 0 : index
    %c0_23 = arith.constant 0 : index
    %c0_24 = arith.constant 0 : index
    %78 = vector.load %arg8[%c0_22, %c0_23, %c0_24] : memref<1x64x128xf32, #tpu.memory_space<vmem>>, vector<1x64x128xf32>
    %79 = vector.shape_cast %78 : vector<1x64x128xf32> to vector<64x128xf32>
    %80 = vector.shape_cast %77 : vector<64x128xf32> to vector<1x64x128xf32>
    tpu.vector_store %arg8[%c0_22, %c0_23, %c0_24], %80 {strides = array<i32>} : memref<1x64x128xf32, #tpu.memory_space<vmem>>, vector<1x64x128xf32>,
    %81 = arith.mulf %12, %11 : vector<128x128xf32>
    %cst_25 = arith.constant dense<0.000000e+00> : vector<128xf32>
    %82 = vector.multi_reduction <add>, %81, %cst_25 [0] : vector<128x128xf32> to vector<128xf32>
    %83 = vector.shape_cast %82 : vector<128xf32> to vector<1x128xf32>
    %84 = arith.divf %83, %14 : vector<1x128xf32>
    %85 = math.log %14 : vector<1x128xf32>
    %86 = arith.subf %84, %85 : vector<1x128xf32>
    %cst_26 = arith.constant 4.85203028 : f32
    %87 = vector.broadcast %cst_26 : f32 to vector<1x128xf32>
    %88 = arith.addf %86, %87 : vector<1x128xf32>
    %c0_27 = arith.constant 0 : index
    %c0_28 = arith.constant 0 : index
    %c0_29 = arith.constant 0 : index
    %89 = vector.load %arg10[%c0_27, %c0_28, %c0_29] : memref<1x1x128xf32, #tpu.memory_space<vmem>>, vector<1x1x128xf32>
    %90 = vector.shape_cast %89 : vector<1x1x128xf32> to vector<1x128xf32>
    %91 = vector.shape_cast %88 : vector<1x128xf32> to vector<1x1x128xf32>
    tpu.vector_store %arg10[%c0_27, %c0_28, %c0_29], %91 {strides = array<i32>} : memref<1x1x128xf32, #tpu.memory_space<vmem>>, vector<1x1x128xf32>,
    %c0_30 = arith.constant 0 : index
    %c0_31 = arith.constant 0 : index
    %c0_32 = arith.constant 0 : index
    %92 = vector.load %arg9[%c0_30, %c0_31, %c0_32] : memref<1x1x128xi32, #tpu.memory_space<vmem>>, vector<1x1x128xi32>
    %93 = vector.shape_cast %92 : vector<1x1x128xi32> to vector<1x128xi32>
    %94 = vector.shape_cast %66 : vector<1x128xi32> to vector<1x1x128xi32>
    tpu.vector_store %arg9[%c0_30, %c0_31, %c0_32], %94 {strides = array<i32>} : memref<1x1x128xi32, #tpu.memory_space<vmem>>, vector<1x1x128xi32>,
    return
  }
  func.func @transform_0(%arg0: i32, %arg1: i32, %arg2: memref<1xi32, #tpu.memory_space<smem>>) -> (i32, i32, i32) {
    %c0_i32 = arith.constant 0 : i32
    %c0_i32_0 = arith.constant 0 : i32
    return %arg0, %c0_i32, %arg1 : i32, i32, i32
  }
  func.func @transform_1(%arg0: i32, %arg1: i32, %arg2: memref<1xi32, #tpu.memory_space<smem>>) -> (i32, i32) {
    %c0_i32 = arith.constant 0 : i32
    %c0_i32_0 = arith.constant 0 : i32
    %c0_i32_1 = arith.constant 0 : i32
    return %c0_i32, %c0_i32_0 : i32, i32
  }
  func.func @transform_2(%arg0: i32, %arg1: i32, %arg2: memref<1xi32, #tpu.memory_space<smem>>) -> (i32, i32) {
    %c0_i32 = arith.constant 0 : i32
    %c0_i32_0 = arith.constant 0 : i32
    %c0_i32_1 = arith.constant 0 : i32
    return %c0_i32, %c0_i32_0 : i32, i32
  }
  func.func @transform_3(%arg0: i32, %arg1: i32, %arg2: memref<1xi32, #tpu.memory_space<smem>>) -> (i32, i32) {
    %c0_i32 = arith.constant 0 : i32
    %c0_i32_0 = arith.constant 0 : i32
    %c0_i32_1 = arith.constant 0 : i32
    return %c0_i32, %c0_i32_0 : i32, i32
  }
  func.func @transform_4(%arg0: i32, %arg1: i32, %arg2: memref<1xi32, #tpu.memory_space<smem>>) -> (i32, i32) {
    %c0_i32 = arith.constant 0 : i32
    %c0_i32_0 = arith.constant 0 : i32
    %c0_i32_1 = arith.constant 0 : i32
    return %c0_i32, %c0_i32_0 : i32, i32
  }
  func.func @transform_5(%arg0: i32, %arg1: i32, %arg2: memref<1xi32, #tpu.memory_space<smem>>) -> (i32, i32, i32) {
    %c0_i32 = arith.constant 0 : i32
    %c0_i32_0 = arith.constant 0 : i32
    return %arg0, %c0_i32, %arg1 : i32, i32, i32
  }
  func.func @transform_6(%arg0: i32, %arg1: i32, %arg2: memref<1xi32, #tpu.memory_space<smem>>) -> (i32, i32, i32) {
    %c0_i32 = arith.constant 0 : i32
    %c0_i32_0 = arith.constant 0 : i32
    return %arg0, %c0_i32, %arg1 : i32, i32, i32
  }
  func.func @transform_7(%arg0: i32, %arg1: i32, %arg2: memref<1xi32, #tpu.memory_space<smem>>) -> (i32, i32, i32) {
    %c0_i32 = arith.constant 0 : i32
    %c0_i32_0 = arith.constant 0 : i32
    return %arg0, %c0_i32, %arg1 : i32, i32, i32
  }
}

</mosaic_0001>

<bundles_post_ra>
// kernel: tpu_custom_call.1
= control target key start
LH: loop header
LB: loop body
LE: loop exit
PB: predicated region body
PF: predicated region fallthrough
CT: control target
= control target key end

     0   :  { %s3683_s0 = inlined_call_operand.<no memory space> [shape: s32[1], index: 0, kind: input, shape index: {}]   ;;  %s3684_s1 = inlined_call_operand.vmem [shape: f32[2,32,256], index: 1, kind: input, shape index: {}]   ;;  %s3685_s2 = inlined_call_operand.vmem [shape: bf16[128,32], index: 2, kind: input, shape index: {}]   ;;  %s3686_s3 = inlined_call_operand.vmem [shape: f32[128,1], index: 3, kind: input, shape index: {}]   ;;  %s3687_s4 = inlined_call_operand.vmem [shape: bf16[64,128], index: 4, kind: input, shape index: {}]   ;;  %s3688_s5 = inlined_call_operand.vmem [shape: bf16[64,128], index: 5, kind: input, shape index: {}]   ;;  %s3689_s6 = inlined_call_operand.hbm [shape: f32[2,64,256], index: 6, kind: output, shape index: {0}]   ;;  %s3690_s7 = inlined_call_operand.hbm [shape: s32[2,1,256], index: 7, kind: output, shape index: {1}]   ;;  %s3691_s8 = inlined_call_operand.hbm [shape: f32[2,1,256], index: 8, kind: output, shape index: {2}]  }
   0x1   :  { %3743 = sst [smem:[#allocation36_spill]] %s3684_s1 }
   0x2   :  { %3744 = sst [smem:[#allocation37_spill]] %s3685_s2 }
   0x3   :  { %3745 = sst [smem:[#allocation38_spill]] %s3686_s3 }
   0x4   :  { %3746 = sst [smem:[#allocation39_spill]] %s3687_s4 }
   0x5   :  { %3747 = sst [smem:[#allocation40_spill]] %s3688_s5 }
   0x6   :  { %14 = sst [smem:[#allocation3]] %s3683_s0 }
   0x7   :  { %15 = vsyncpa [#allocation6], 0 }
   0x8   :  { %17 = vsyncpa [#allocation6 + $0x1], 0 }
   0x9   :  { %18 = vsyncpa [#allocation8], 0 }
   0xa   :  { %20 = vsyncpa [#allocation8 + $0x1], 0  ;;  %s2332_s29 = smov 0   ;;  %s2334_s30 = smov 0  }
   0xb   :  { %s2336_s9 = smov 0   ;;  %s2338_s10 = smov 0  }
   0xc   :  { %s2340_s11 = smov 0   ;;  %s2342_s12 = smov 0  }
   0xd   :  { %s2344_s13 = smov 0   ;;  %s2346_s14 = smov 0  }
   0xe LB: > { %s3693_s0 = sadd.s32 4294967295, %s2277_s14   ;;  %s3692_s15 = sadd.s32 4294967294, %s2277_s14   ;;  %s2277_s14 = sphi %s2346_s14, %s26_s14   ;;  %s2273_s13 = sphi %s2344_s13, %s3893_s13   ;;  %s2269_s12 = sphi %s2342_s12, %s3892_s12   ;;  %s2265_s11 = sphi %s2340_s11, %s3891_s11   ;;  %s2261_s10 = sphi %s2338_s10, %s3890_s10   ;;  %s2257_s9 = sphi %s2336_s9, %s3889_s9   ;;  %s2253_s30 = sphi %s2334_s30, %s3888_s30   ;;  %s2249_s29 = sphi %s2332_s29, %s3887_s29  }
   0xf   : > { %s35_s16 = sadd.s32 1, %s2269_s12  ;;  %s38_s17 = sadd.s32 1, %s2273_s13 }
  0x10   : > { %p36_p0 = scmp.ge.s32.totalorder %s35_s16, 2  ;;  %p54_p1 = scmp.ne.s32.totalorder %s2257_s9, %s2253_s30 }
  0x11   : > { %p55_p2 = scmp.eq.s32.totalorder %s2277_s14, 0  ;;  %p170_p5 = scmp.eq.s32.totalorder %s3693_s0, 3 }
  0x12   : > { %s3895_s16 = smov (%p36_p0, %s35_s16), 0  ;;  %s3897_s17 = smov (!%p36_p0, %s38_s17), %s2273_s13 }
  0x13   : > { %s43_s18 = ssub.s32 %s2269_s12, %s3895_s16  ;;  %p2384_p3 = por %p55_p2, %p54_p1 }
  0x14   : > { %p40_p4 = scmp.ge.s32.totalorder %s3897_s17, 2  ;;  %p175_p6 = scmp.ne.s32.totalorder %s2253_s30, %s2249_s29 }
  0x15   : > { %p176_p7 = scmp.eq.s32.totalorder %s3692_s15, 3  ;;  %p2396_p8 = por %p170_p5, %p54_p1 }
  0x16   : > { %s3899_s17 = smov (%p40_p4, %s3897_s17), 0  ;;  %s47_s24 = sadd.s32 1, %s2257_s9 }
  0x17   : > { %3749 = sst [smem:[#allocation12_spill]] %s3899_s17  ;;  %p2400_p9 = por %p176_p7, %p175_p6 }
  0x18   : > { %s42_s22 = ssub.s32 %s2273_s13, %s3899_s17  ;;  %p1775_p11 = scmp.ge.s32.totalorder %s2277_s14, 4 }
  0x19   : > { %s44_s23 = sor.u32 %s43_s18, %s42_s22 }
  0x1a   : > { %p45_p10 = scmp.eq.s32.totalorder %s44_s23, 0  ;;  %260 = sbr.rel (%p1775_p11) target bundleno = 45 (0x2d), region = 32 }
  0x1c   : > { %s2408_s25 = scalar_select %p45_p10, %s2257_s9, %s47_s24  }
  0x1f   : > { %263 = sbr.rel (!%p2384_p3) target bundleno = 45 (0x2d), region = 36  ;;  %s265_s26 = sand.u32 (%p2384_p3), 1, %s2257_s9  }
  0x20   : > { %s1777_s27 = sshll.u32 (%p2384_p3), %s2273_s13, 3  ;;  %s1776_s28 = sshll.u32 (%p2384_p3), %s265_s26, 5 }
  0x21   : > { %s269_s15 = sadd.s32 (%p2384_p3), %s2269_s12, %s1777_s27  ;;  %s3752_s1 = sld [smem:[#allocation36_spill]] (%p2384_p3) }
  0x22   : > { %s1778_s0 = sshll.u32 (%p2384_p3), %s269_s15, 3  ;;  %s267_s23 = scalar_lea.vmem (%p2384_p3), [#allocation4], %s1776_s28 }
  0x27   : > { %s271_s22 = scalar_lea.vmem %s3752_s1, %s1778_s0 }
  0x28   : > { %v306_v0 = vld [vmem:[%s271_s22] sm:$0xff]  ;;  %v308_v1 = vld [vmem:[%s271_s22 + $0x10] sm:$0xff] }
  0x29   : > { %v310_v2 = vld [vmem:[%s271_s22 + $0x20] sm:$0xff]  ;;  %307 = vst [vmem:[%s267_s23] sm:$0xff] %v306_v0  ;;  %v312_v3 = vld [vmem:[%s271_s22 + $0x30] sm:$0xff] }
  0x2a   : > { %309 = vst [vmem:[%s267_s23 + $0x8] sm:$0xff] %v308_v1 }
  0x2b   : > { %311 = vst [vmem:[%s267_s23 + $0x10] sm:$0xff] %v310_v2 }
  0x2c   : > { %313 = vst [vmem:[%s267_s23 + $0x18] sm:$0xff] %v312_v3 }
  0x2d PF: > { %p1779_p12 = scmp.ge.s32.totalorder %s2277_s14, 1  ;;  %p318_p13 = scmp.lt.s32.totalorder %s2277_s14, 5 }
  0x2f   : > { %p319_p0 = pnand %p1779_p12, %p318_p13 }
  0x31   : > { %322 = sbr.rel (%p319_p0) target bundleno = 676 (0x2a4), region = 74 }
  0x36   : > { %s2422_s15 = sand.u32 1, %s2253_s30   ;;  %s3753_s3 = sld [smem:[#allocation38_spill]]  ;;  %v2279_v5 = vmov 0   ;;  %vm523_vm0 = vcmask 261120   ;;  %v691_v46 = vlaneseq }
  0x37   : > { %s1780_s19 = sshll.u32 %s2422_s15, 5  ;;  %2020 = vset.pattern.permute.xlu0 %v2279_v5  ;;  %2021 = vset.pattern.permute.xlu1 %v2279_v5  ;;  %s3754_s2 = sld [smem:[#allocation37_spill]] }
  0x38   : > { %2022 = vset.pattern.permute.xlu2 %v2279_v5  ;;  %s327_s27 = scalar_lea.vmem [#allocation4], %s1780_s19  ;;  %s1822_s0 = sshll.u32 %s2265_s11, 8  ;;  %v2529_v47 = vshrl.u32 %v691_v46, 7  ;;  %v709_v48 = vand.u32 127, %v691_v46 }
  0x39   : > { %v367_v7 = vld [vmem:[%s327_s27 + $0x10] sm:$0xff]  ;;  %v368_v8 = vld [vmem:[%s327_s27 + $0x18] sm:$0xff]  ;;  %v365_v9 = vld [vmem:[%s327_s27] sm:$0xff]  ;;  %s1823_s17 = sshll.u32 %s2261_s10, 7  ;;  %s690_s24 = sld [smem:[#allocation3]] }
  0x3a   : > { %v370_v10 = vpack.c.bf16 %v368_v8, %v367_v7  ;;  %v366_v11 = vld [vmem:[%s327_s27 + $0x8] sm:$0xff]  ;;  %s689_s19 = sadd.s32 %s1823_s17, %s1822_s0  ;;  %3755 = vst [vmem:[#allocation13_spill] sm:$0xff] %v2529_v47  ;;  %v2532_v50 = vadd.s32 8, %v2529_v47  ;;  %v2535_v51 = vadd.s32 40, %v2529_v47  ;;  %v2538_v52 = vadd.s32 72, %v2529_v47  ;;  %s3740_s26 = scalar_lea.vmem [#allocation9], %s2422_s15 }
  0x3b   : > { %v369_v12 = vpack.c.bf16 %v366_v11, %v365_v9  ;;  %v710_v49 = vstv %s689_s19  ;;  %v2541_v53 = vadd.s32 104, %v2529_v47  ;;  %s3741_s27 = scalar_lea.vmem [#allocation7], %s2422_s15  ;;  %s3879_s5 = sld [smem:[#allocation40_spill]] }
  0x3c   : > { %v387_v4 = vld [vmem:[%s3753_s3] sm:$0xff]  ;;  %v389_v6 = vld [vmem:[%s3753_s3 + $0x10] sm:$0xff]  ;;  %554 = vmatpush.bf16.msra.mxu0 %v370_v10  ;;  %1927 = vmatpush.bf16.msra.mxu3 %v370_v10  ;;  %v388_v13 = vld [vmem:[%s3753_s3 + $0x8] sm:$0xff]  ;;  %3756 = vst [vmem:[#allocation14_spill] sm:$0xff] %v2532_v50  ;;  %v711_v55 = vadd.s32 %v710_v49, %v709_v48  ;;  %v714_v56 = vmul.u32 2246822519, %v2532_v50 }
  0x3d   : > { %405 = vperm.xlu0 %2020, %v387_v4   ;;  %415 = vperm.xlu1 %2021, %v389_v6   ;;  %v390_v14 = vld [vmem:[%s3753_s3 + $0x18] sm:$0xff]  ;;  %v1911_v15 = vld [vmem:[%s3754_s2] sm:$0xff]  ;;  %v1916_v16 = vld [vmem:[%s3754_s2 + $0x28] sm:$0xff]  ;;  %3757 = vst [vmem:[#allocation15_spill] sm:$0xff] %v2535_v51  ;;  %v718_v57 = vmul.u32 2246822519, %v2535_v51 }
  0x3e   : > { %v391_v17 = vld [vmem:[%s3753_s3 + $0x20] sm:$0xff]  ;;  %v393_v18 = vld [vmem:[%s3753_s3 + $0x30] sm:$0xff]  ;;  %v394_v19 = vld [vmem:[%s3753_s3 + $0x38] sm:$0xff]  ;;  %3758 = vst [vmem:[#allocation16_spill] sm:$0xff] %v2538_v52  ;;  %v722_v58 = vmul.u32 2246822519, %v2538_v52 }
  0x3f   : > { %425 = vperm.xlu2 %2022, %v391_v17   ;;  %v396_v20 = vld [vmem:[%s3753_s3 + $0x48] sm:$0xff]  ;;  %v397_v21 = vld [vmem:[%s3753_s3 + $0x50] sm:$0xff]  ;;  %v399_v25 = vld [vmem:[%s3753_s3 + $0x60] sm:$0xff]  ;;  %3759 = vst [vmem:[#allocation17_spill] sm:$0xff] %v2541_v53  ;;  %v2550_v60 = vmul.u32 2654435761, %v711_v55  ;;  %v2561_v5 = vstv %s690_s24 }
  0x40   : > { %555 = vmatpush.bf16.msra.mxu0 %v369_v12  ;;  %1928 = vmatpush.bf16.msra.mxu3 %v369_v12  ;;  %v1912_v22 = vld [vmem:[%s3754_s2 + $0x8] sm:$0xff]  ;;  %v1917_v23 = vld [vmem:[%s3754_s2 + $0x30] sm:$0xff]  ;;  %v395_v27 = vld [vmem:[%s3753_s3 + $0x40] sm:$0xff]  ;;  %v726_v61 = vmul.u32 2246822519, %v2541_v53  ;;  %s3880_s4 = sld [smem:[#allocation39_spill]] }
  0x41   : > { %v392_v24 = vld [vmem:[%s3753_s3 + $0x28] sm:$0xff]  ;;  %v402_v28 = vld [vmem:[%s3753_s3 + $0x78] sm:$0xff]  ;;  %v1913_v29 = vld [vmem:[%s3754_s2 + $0x10] sm:$0xff]  ;;  %v730_v0 = vadd.s32 %v714_v56, %v2550_v60  ;;  %v734_v1 = vadd.s32 %v718_v57, %v2550_v60  ;;  %v738_v2 = vadd.s32 %v722_v58, %v2550_v60  ;;  %s3881_s24 = sadd.s32 4294967295, %s2277_s14   ;;  %s1907_s18 = sshll.u32 %s2265_s11, 1 }
  0x42   : > { %v400_v26 = vld [vmem:[%s3753_s3 + $0x68] sm:$0xff]  ;;  %v1918_v30 = vld [vmem:[%s3754_s2 + $0x38] sm:$0xff]  ;;  %v401_v32 = vld [vmem:[%s3753_s3 + $0x70] sm:$0xff]  ;;  %v742_v3 = vadd.s32 %v726_v61, %v2550_v60  ;;  %s3586_s28 = sand.u32 1, %s3881_s24   ;;  %s1614_s22 = sadd.s32 %s2261_s10, %s1907_s18 }
  0x43   : > { %1814 = vmatmul.msk.bf16.vlgmr.msra.gmra.mxu0 %vm523_vm0, %v1911_v15  ;;  %1819 = vmatmul.msk.bf16.vlgmr.msra.gmra.mxu3 %vm523_vm0, %v1916_v16  ;;  %v398_v31 = vld [vmem:[%s3753_s3 + $0x58] sm:$0xff]  ;;  %v1915_v34 = vld [vmem:[%s3754_s2 + $0x20] sm:$0xff]  ;;  %v747_v6 = vadd.s32 %v2561_v5, %v730_v0  ;;  %v751_v7 = vadd.s32 %v2561_v5, %v734_v1  ;;  %v755_v8 = vadd.s32 %v2561_v5, %v738_v2  ;;  %s1615_s1 = scalar_lea.hbm %s3690_s7, %s1614_s22  ;;  %s3742_s17 = scalar_lea.sflag [#allocation8], %s3586_s28 }
  0x44   : > { %v1914_v33 = vld [vmem:[%s3754_s2 + $0x18] sm:$0xff]  ;;  %v759_v9 = vadd.s32 %v2561_v5, %v742_v3  ;;  %s3882_s2 = scalar_lea.vmem [#allocation7], %s2422_s15  ;;  %s1619_s0 = sshll.u32 %s1615_s1, 4  ;;  %s1620_s0 = int_to_ptr.hbm [resolvable:$true] %s1619_s0 }
  0x45   : > { %410 = vperm.xlu0 %2020, %v388_v13   ;;  %420 = vperm.xlu1 %2021, %v390_v14   ;;  %v763_v10 = vshrl.u32 %v747_v6, 16  ;;  %v767_v11 = vshrl.u32 %v751_v7, 16  ;;  %v771_v12 = vshrl.u32 %v755_v8, 16  ;;  %s2137_s19 = sshra.s32 %s1620_s0, 4  ;;  %s2143_s18 = scalar_lea.hbm %s3690_s7, 4  ;;  %s2138_s19 = int_to_ptr.hbm [resolvable:$true] %s2137_s19 }
  0x46   : > { %v775_v13 = vshrl.u32 %v759_v9, 16  ;;  %s2139_s3 = scalar_lea.hbm %s2138_s19, 1  ;;  %p2144_p4 = scmp.lt.s32.totalorder %s2138_s19, %s3690_s7 }
  0x47   : > { %430 = vperm.xlu2 %2022, %v392_v24   ;;  %v779_v16 = vxor.u32 %v763_v10, %v747_v6  ;;  %v783_v17 = vxor.u32 %v767_v11, %v751_v7  ;;  %p2140_p1 = scmp.ne.s32.totalorder %s2138_s19, %s2139_s3  ;;  %p2145_p5 = scmp.lt.s32.totalorder %s2143_s18, %s2139_s3 }
  0x49   : > { %p2141_p2 = pnand %p2140_p1, %p2396_p8  ;;  %p2146_p6 = por %p2145_p5, %p2144_p4 }
  0x4b   : > { %p2142_p3 = pneg %p2141_p2 }
  0x4d   : > { %435 = vperm.xlu0 %2020, %v393_v18   ;;  %440 = vperm.xlu1 %2021, %v394_v19   ;;  %v787_v18 = vxor.u32 %v771_v12, %v755_v8  ;;  %v791_v19 = vxor.u32 %v775_v13, %v759_v9  ;;  %p2147_p7 = pnand %p2146_p6, %p2142_p3 }
  0x4f   : > { %445 = vperm.xlu2 %2022, %v395_v27   ;;  %v807_v24 = vmul.u32 2246822507, %v791_v19 }
  0x53   : > { %1815 = vmatmul.msk.bf16.gmra.mxu0 %vm523_vm0, %v1912_v22  ;;  %1820 = vmatmul.msk.bf16.gmra.mxu3 %vm523_vm0, %v1917_v23  ;;  %v803_v22 = vmul.u32 2246822507, %v787_v18 }
  0x55   : > { %450 = vperm.xlu0 %2020, %v396_v20   ;;  %455 = vperm.xlu1 %2021, %v397_v21   ;;  %v795_v20 = vmul.u32 2246822507, %v779_v16  ;;  %v799_v21 = vmul.u32 2246822507, %v783_v17 }
  0x57   : > { %460 = vperm.xlu2 %2022, %v398_v31   ;;  %v815_v27 = vshrl.u32 %v799_v21, 13 }
  0x5d   : > { %465 = vperm.xlu0 %2020, %v399_v25   ;;  %470 = vperm.xlu1 %2021, %v400_v26   ;;  %v811_v26 = vshrl.u32 %v795_v20, 13 }
  0x5f   : > { %475 = vperm.xlu2 %2022, %v401_v32   ;;  %v827_v31 = vxor.u32 %v811_v26, %v795_v20  ;;  %v831_v32 = vxor.u32 %v815_v27, %v799_v21  ;;  %v2608_v21 = vadd.s32 32, %v2529_v47  ;;  %v2619_v26 = vadd.s32 64, %v2529_v47 }
  0x61   : > { %v843_v48 = vmul.u32 3266489909, %v827_v31  ;;  %v847_v49 = vmul.u32 3266489909, %v831_v32  ;;  %3762 = vst [vmem:[#allocation20_spill] sm:$0xff] %v2608_v21 }
  0x62   : > { %3765 = vst [vmem:[#allocation23_spill] sm:$0xff] %v2619_v26 }
  0x63   : > { %1816 = vmatmul.msk.bf16.gmra.mxu0 %vm523_vm0, %v1913_v29  ;;  %1821 = vmatmul.msk.bf16.gmra.mxu3 %vm523_vm0, %v1918_v30  ;;  %v823_v30 = vshrl.u32 %v807_v24, 13  ;;  %v859_v58 = vshrl.u32 %v843_v48, 16  ;;  %v863_v61 = vshrl.u32 %v847_v49, 16 }
  0x65   : > { %480 = vperm.xlu0 %2020, %v402_v28   ;;  %v819_v28 = vshrl.u32 %v803_v22, 13  ;;  %v875_v6 = vxor.u32 %v859_v58, %v843_v48  ;;  %v879_v7 = vxor.u32 %v863_v61, %v847_v49 }
  0x67   : > { %v891_v13 = vshrl.u32 %v875_v6, 9  ;;  %v895_v16 = vshrl.u32 %v879_v7, 9 }
  0x69   : > { %v911_v19 = vcvt.s32.f32 %v895_v16 }
  0x73   : > { %1817 = vmatmul.msk.bf16.gmra.mxu0 %vm523_vm0, %v1914_v33  ;;  %v835_v33 = vxor.u32 %v819_v28, %v803_v22  ;;  %v2624_v28 = vadd.s32 80, %v2529_v47 }
  0x75   : > { %v851_v55 = vmul.u32 3266489909, %v835_v33  ;;  %3766 = vst [vmem:[#allocation24_spill] sm:$0xff] %v2624_v28  ;;  %v2633_v33 = vadd.s32 112, %v2529_v47 }
  0x77   : > { %v867_v0 = vshrl.u32 %v851_v55, 16  ;;  %3769 = vst [vmem:[#allocation27_spill] sm:$0xff] %v2633_v33 }
  0x79   : > { %v883_v8 = vxor.u32 %v867_v0, %v851_v55 }
  0x7b   : > { %v899_v17 = vshrl.u32 %v883_v8, 9 }
  0x7d   : > { %v915_v20 = vcvt.s32.f32 %v899_v17 }
  0x83   : > { %1818 = vmatmul.msk.bf16.gmra.mxu0 %vm523_vm0, %v1915_v34  ;;  %v839_v34 = vxor.u32 %v823_v30, %v807_v24  ;;  %v927_v24 = vadd.f32 0.5, %v911_v19  ;;  %v2630_v30 = vadd.s32 96, %v2529_v47 }
  0x85   : > { %v855_v56 = vmul.u32 3266489909, %v839_v34  ;;  %3768 = vst [vmem:[#allocation26_spill] sm:$0xff] %v2630_v30  ;;  %v943_v32 = vmul.f32 1.1920929e-07, %v927_v24  ;;  %v2636_v34 = vadd.s32 120, %v2529_v47 }
  0x86   : > { %v725_v17 = vmul.u32 2246822519, %v2630_v30 }
  0x87   : > { %v871_v2 = vshrl.u32 %v855_v56, 16  ;;  %3770 = vst [vmem:[#allocation28_spill] sm:$0xff] %v2636_v34  ;;  %v728_v19 = vmul.u32 2246822519, %v2636_v34 }
  0x99   : > { %v2517_v41 = vpop.permute.xlu2 %425 }
  0xa1   : > { %v2543_v54 = vpop.permute.xlu2 %430 }
  0xa9   : > { %v2567_v14 = vpop.permute.xlu2 %445 }
  0xaf   : > { %v2509_v37 = vpop.permute.xlu0 %405  ;;  %v2511_v38 = vpop.permute.xlu1 %415 }
  0xb1   : > { %v461_v57 = vpop.permute.xlu2 %460 }
  0xb7   : > { %v2521_v42 = vpop.permute.xlu0 %410  ;;  %v2523_v43 = vpop.permute.xlu1 %420 }
  0xb9   : > { %v476_v49 = vpop.permute.xlu2 %475 }
  0xbf   : > { %v2553_v62 = vpop.permute.xlu0 %435  ;;  %v2555_v63 = vpop.permute.xlu1 %440 }
  0xc0   : > { %v2505_v35 = vpop.f32.mrf.mxu0 }
  0xc1   : > { %v2575_v1 = vadd.f32 %v2505_v35, %v2509_v37  ;;  %v887_v35 = vxor.u32 %v871_v2, %v855_v56 }
  0xc6   : > { %v2513_v39 = vpop.f32.mrf.mxu3 }
  0xc7   : > { %v2571_v23 = vpop.permute.xlu0 %450  ;;  %v456_v25 = vpop.permute.xlu1 %455 }
  0xc8   : > { %v2507_v36 = vpop.f32.mrf.mxu0  ;;  %v2578_v3 = vadd.f32 %v2513_v39, %v456_v25  ;;  %v931_v25 = vadd.f32 0.5, %v915_v20 }
  0xc9   : > { %v2582_v9 = vadd.f32 %v2507_v36, %v2521_v42  ;;  %v2605_v42 = vadd.s32 24, %v2529_v47 }
  0xca   : > { %v947_v56 = vmul.f32 1.1920929e-07, %v931_v25 }
  0xcb   : > { %3761 = vst [vmem:[#allocation19_spill] sm:$0xff] %v2605_v42  ;;  %v716_v0 = vmul.u32 2246822519, %v2605_v42 }
  0xce   : > { %v2527_v45 = vpop.f32.mrf.mxu3 }
  0xcf   : > { %v466_v11 = vpop.permute.xlu0 %465  ;;  %v2589_v12 = vadd.f32 %v2527_v45, %v461_v57  ;;  %v471_v39 = vpop.permute.xlu1 %470  ;;  %v713_v57 = vmul.u32 2246822519, %v2529_v47 }
  0xd0   : > { %v2515_v40 = vpop.f32.mrf.mxu0 }
  0xd1   : > { %v2586_v10 = vadd.f32 %v2515_v40, %v2511_v38  ;;  %v2602_v40 = vadd.s32 16, %v2529_v47 }
  0xd3   : > { %3760 = vst [vmem:[#allocation18_spill] sm:$0xff] %v2602_v40  ;;  %v715_v61 = vmul.u32 2246822519, %v2602_v40 }
  0xd5   : > { %v731_v20 = vadd.s32 %v715_v61, %v2550_v60 }
  0xd6   : > { %v587_v4 = vpop.f32.mrf.mxu3 }
  0xd7   : > { %v2591_v37 = vadd.f32 %v587_v4, %v466_v11  ;;  %v907_v4 = vcvt.s32.f32 %v891_v13 }
  0xd8   : > { %v2525_v44 = vpop.f32.mrf.mxu0 }
  0xd9   : > { %v2595_v18 = vadd.f32 %v2525_v44, %v2523_v43  ;;  %v903_v44 = vshrl.u32 %v887_v35, 9  ;;  %v923_v22 = vadd.f32 0.5, %v907_v4 }
  0xdb   : > { %v939_v31 = vmul.f32 1.1920929e-07, %v923_v22  ;;  %v919_v55 = vcvt.s32.f32 %v903_v44  ;;  %v732_v44 = vadd.s32 %v716_v0, %v2550_v60 }
  0xdd   : > { %2023 = vlog2.f32 %v939_v31 }
  0xde   : > { %v589_v29 = vpop.f32.mrf.mxu3  ;;  %2025 = vlog2.f32 %v943_v32 }
  0xdf   : > { %v2610_v43 = vadd.f32 %v589_v29, %v471_v39  ;;  %v2627_v29 = vadd.s32 88, %v2529_v47  ;;  %2027 = vlog2.f32 %v947_v56  ;;  %v729_v39 = vadd.s32 %v713_v57, %v2550_v60 }
  0xe0   : > { %v2548_v59 = vpop.f32.mrf.mxu0 }
  0xe1   : > { %v2599_v36 = vadd.f32 %v2548_v59, %v2517_v41  ;;  %v2613_v41 = vadd.s32 48, %v2529_v47  ;;  %v2616_v59 = vadd.s32 56, %v2529_v47  ;;  %3767 = vst [vmem:[#allocation25_spill] sm:$0xff] %v2627_v29  ;;  %v724_v16 = vmul.u32 2246822519, %v2627_v29 }
  0xe3   : > { %3763 = vst [vmem:[#allocation21_spill] sm:$0xff] %v2613_v41  ;;  %v720_v8 = vmul.u32 2246822519, %v2616_v59  ;;  %v2024_v22 = vpop.eup %2023 }
  0xe4   : > { %3764 = vst [vmem:[#allocation22_spill] sm:$0xff] %v2616_v59  ;;  %v957_v57 = vmul.f32 0.6931472, %v2024_v22 }
  0xe5   : > { %v736_v32 = vadd.s32 %v720_v8, %v2550_v60  ;;  %v741_v8 = vadd.s32 %v725_v17, %v2550_v60 }
  0xe6   : > { %v592_v38 = vpop.f32.mrf.mxu3 }
  0xe7   : > { %v2653_v6 = vadd.f32 %v592_v38, %v476_v49  ;;  %v727_v38 = vmul.u32 2246822519, %v2633_v33  ;;  %v2026_v49 = vpop.eup %2025 }
  0xe8   : > { %v2569_v15 = vpop.f32.mrf.mxu0  ;;  %v965_v0 = vmul.f32 0.6931472, %v2026_v49  ;;  %v753_v49 = vadd.s32 %v2561_v5, %v736_v32 }
  0xe9   : > { %v2640_v48 = vadd.f32 %v2569_v15, %v2543_v54  ;;  %v717_v54 = vmul.u32 2246822519, %v2608_v21  ;;  %v719_v15 = vmul.u32 2246822519, %v2613_v41  ;;  %v743_v34 = vadd.s32 %v727_v38, %v2550_v60 }
  0xea   : > { %v2699_v38 = vsub.f32 0.0, %v965_v0 }
  0xeb   : > { %v598_v11 = vmax.f32 %v2582_v9, %v2640_v48  ;;  %v733_v25 = vadd.s32 %v717_v54, %v2550_v60  ;;  %v735_v31 = vadd.s32 %v719_v15, %v2550_v60  ;;  %v2028_v54 = vpop.eup %2027  ;;  %v760_v32 = vadd.s32 %v2561_v5, %v743_v34 }
  0xec   : > { %vm1082_vm3 = vweird.f32 %v2699_v38  ;;  %v1086_v21 = vand.u32 2147483647, %v2699_v38  ;;  %v1088_v42 = vand.u32 2147483648, %v2699_v38 }
  0xee   : > { %v594_v35 = vpop.f32.mrf.mxu3  ;;  %vm2850_vm10 = vcmp.eq.f32.partialorder %v1086_v21, 8.507059e+37  ;;  %v1089_v51 = vor.u32 1.1754944e-38, %v1088_v42 }
  0xf0   : > { %v572_v46 = vpop.f32.mrf.mxu0 }
  0xf1   : > { %v2644_v58 = vadd.f32 %v572_v46, %v2553_v62  ;;  %v721_v62 = vmul.u32 2246822519, %v2619_v26  ;;  %v723_v46 = vmul.u32 2246822519, %v2624_v28 }
  0xf3   : > { %v599_v13 = vmax.f32 %v2586_v10, %v2644_v58  ;;  %v737_v27 = vadd.s32 %v721_v62, %v2550_v60  ;;  %v746_v62 = vadd.s32 %v2561_v5, %v729_v39  ;;  %v750_v39 = vadd.s32 %v2561_v5, %v733_v25 }
  0xf5   : > { %v603_v61 = vmax.f32 %v599_v13, %v2578_v3  ;;  %v748_v13 = vadd.s32 %v2561_v5, %v731_v20  ;;  %v752_v20 = vadd.s32 %v2561_v5, %v735_v31  ;;  %v758_v31 = vadd.s32 %v2561_v5, %v741_v8 }
  0xf7   : > { %v768_v33 = vshrl.u32 %v752_v20, 16 }
  0xf8   : > { %v574_v45 = vpop.f32.mrf.mxu0 }
  0xf9   : > { %v2649_v2 = vadd.f32 %v574_v45, %v2555_v63  ;;  %v935_v63 = vadd.f32 0.5, %v919_v55  ;;  %v481_v45 = vpop.permute.xlu0 %480 }
  0xfa   : > { %v2671_v24 = vadd.f32 %v594_v35, %v481_v45  ;;  %v739_v35 = vadd.s32 %v723_v46, %v2550_v60  ;;  %v740_v45 = vadd.s32 %v724_v16, %v2550_v60  ;;  %v749_v46 = vadd.s32 %v2561_v5, %v732_v44 }
  0xfb   : > { %v600_v4 = vmax.f32 %v2595_v18, %v2649_v2  ;;  %v951_v56 = vmul.f32 1.1920929e-07, %v935_v63  ;;  %v2687_v63 = vsub.f32 0.0, %v957_v57  ;;  %v3772_v16 = vmax.f32 %v2575_v1, %v2599_v36 }
  0xfc   : > { %3771 = vst [vmem:[#allocation29_spill] sm:$0xff] %v2671_v24  ;;  %v754_v57 = vadd.s32 %v2561_v5, %v737_v27 }
  0xfd   : > { %v604_v15 = vmax.f32 %v600_v4, %v2589_v12  ;;  %2029 = vlog2.f32 %v951_v56  ;;  %v757_v56 = vadd.s32 %v2561_v5, %v740_v45  ;;  %v765_v45 = vshrl.u32 %v749_v46, 16 }
  0xfe   : > { %2031 = vrcp.f32 %v2687_v63  ;;  %v770_v53 = vshrl.u32 %v754_v57, 16  ;;  %vm1022_vm1 = vweird.f32 %v2687_v63 }
  0xff   : > { %v608_v44 = vmax.f32 %v604_v15, %v2671_v24  ;;  %2033 = vrcp.f32 %v2699_v38  ;;  %v773_v8 = vshrl.u32 %v757_v56, 16 }
 0x100   : > { %v577_v7 = vpop.f32.mrf.mxu0 }
 0x101   : > { %v2677_v55 = vadd.f32 %v577_v7, %v2567_v14  ;;  %v744_v14 = vadd.s32 %v728_v19, %v2550_v60  ;;  %v607_v60 = vmax.f32 %v603_v61, %v2653_v6  ;;  %v973_v19 = vmul.f32 0.6931472, %v2028_v54 }
 0x102   : > { %v762_v61 = vshrl.u32 %v746_v62, 16  ;;  %v764_v54 = vshrl.u32 %v748_v13, 16  ;;  %v2743_v26 = vxor.u32 %v773_v8, %v757_v56 }
 0x103   : > { %v601_v4 = vmax.f32 %v3772_v16, %v2677_v55  ;;  %v761_v27 = vadd.s32 %v2561_v5, %v744_v14  ;;  %v2030_v15 = vpop.eup %2029  ;;  %v766_v16 = vshrl.u32 %v750_v39, 16 }
 0x104   : > { %v2721_v28 = vpop.eup %2031  ;;  %v981_v34 = vmul.f32 0.6931472, %v2030_v15  ;;  %v2724_v14 = vxor.u32 %v764_v54, %v748_v13 }
 0x105   : > { %v605_v0 = vmax.f32 %v601_v4, %v2591_v37  ;;  %v769_v4 = vshrl.u32 %v753_v49, 16  ;;  %v1018_v13 = vmul.f32 %v2721_v28, %v2687_v63  ;;  %vm1023_vm2 = vweird.f32 %v2721_v28 }
 0x106   : > { %vm2810_vm5 = vmor %vm1022_vm1, %vm1023_vm2 }
 0x108   : > { %v579_v7 = vpop.f32.mrf.mxu0 }
 0x109   : > { %v2697_v17 = vadd.f32 %v579_v7, %v2571_v23  ;;  %v756_v23 = vadd.s32 %v2561_v5, %v739_v35  ;;  %v610_v35 = vmax.f32 %v607_v60, %v608_v44  ;;  %v776_v5 = vshrl.u32 %v760_v32, 16  ;;  %v2726_v60 = vpop.eup %2033 }
 0x10a   : > { %vm1083_vm4 = vweird.f32 %v2726_v60 }
 0x10b   : > { %v602_v22 = vmax.f32 %v598_v11, %v2697_v17  ;;  %v2715_v11 = vsub.f32 0.0, %v973_v19  ;;  %v772_v29 = vshrl.u32 %v756_v23, 16  ;;  %v774_v19 = vshrl.u32 %v758_v31, 16  ;;  %vm2820_vm6 = vmor %vm1082_vm3, %vm1083_vm4 }
 0x10d   : > { %v606_v25 = vmax.f32 %v602_v22, %v2610_v43  ;;  %v2719_v22 = vxor.u32 %v762_v61, %v746_v62  ;;  %2035 = vrcp.f32 %v2715_v11  ;;  %v2730_v62 = vxor.u32 %v766_v16, %v750_v39 }
 0x10e   : > { %v2732_v61 = vxor.u32 %v768_v33, %v752_v20  ;;  %v2741_v54 = vxor.u32 %v772_v29, %v756_v23  ;;  %v1078_v33 = vmul.f32 %v2726_v60, %v2699_v38  ;;  %v2749_v39 = vxor.u32 %v774_v19, %v758_v31 }
 0x10f   : > { %v609_v7 = vmax.f32 %v605_v0, %v606_v25  ;;  %v777_v0 = vshrl.u32 %v761_v27, 16  ;;  %v2728_v25 = vxor.u32 %v765_v45, %v749_v46  ;;  %v794_v15 = vmul.u32 2246822507, %v2719_v22 }
 0x110   : > { %v2745_v46 = vsub.f32 0.0, %v981_v34  ;;  %v3713_v56 = vmul.u32 2246822507, %v2732_v61  ;;  %v1079_v8 = vsub.f32 1.0, %v1078_v33  ;;  %v3715_v19 = vmul.u32 2246822507, %v2743_v26 }
 0x111   : > { %v611_v30 = vmax.f32 %v609_v7, %v610_v35  ;;  %v2734_v35 = vxor.u32 %v769_v4, %v753_v49  ;;  %v2736_v7 = vxor.u32 %v770_v53, %v754_v57  ;;  %v796_v53 = vmul.u32 2246822507, %v2724_v14 }
 0x112   : > { %v2752_v49 = vxor.u32 %v776_v5, %v760_v32  ;;  %v798_v57 = vmul.u32 2246822507, %v2730_v62  ;;  %v2758_v23 = vxor.u32 %v777_v0, %v761_v27  ;;  %v810_v16 = vshrl.u32 %v794_v15, 13 }
 0x113   : > { %v612_v44 = vrot.slane %v611_v30, 4  ;;  %v2756_v29 = vpop.eup %2035  ;;  %v3717_v45 = vmul.u32 2246822507, %v2734_v35  ;;  %v1019_v4 = vsub.f32 1.0, %v1018_v13  ;;  %v3716_v22 = vmul.u32 2246822507, %v2736_v7 }
 0x114   : > { %v3714_v32 = vmul.u32 2246822507, %v2741_v54  ;;  %2037 = vrcp.f32 %v2745_v46  ;;  %v1138_v5 = vmul.f32 %v2756_v29, %v2715_v11  ;;  %v816_v62 = vshrl.u32 %v3713_v56, 13 }
 0x115   : > { %v613_v52 = vmax.f32 %v611_v30, %v612_v44  ;;  %v797_v30 = vmul.u32 2246822507, %v2728_v25  ;;  %v812_v44 = vshrl.u32 %v796_v53, 13  ;;  %v814_v25 = vshrl.u32 %v798_v57, 13 }
 0x116   : > { %v1020_v33 = vmul.f32 %v2721_v28, %v1019_v4  ;;  %v818_v34 = vshrl.u32 %v3716_v22, 13  ;;  %v1080_v14 = vmul.f32 %v2726_v60, %v1079_v8  ;;  %v821_v59 = vshrl.u32 %v3715_v19, 13 }
 0x117   : > { %v614_v20 = vrot.slane %v613_v52, 2  ;;  %v813_v0 = vshrl.u32 %v797_v30, 13  ;;  %v3773_v56 = vmul.u32 2246822507, %v2749_v39  ;;  %v1028_v19 = vand.u32 2147483648, %v2687_v63 }
 0x118   : > { %v3774_v22 = vmul.u32 2246822507, %v2752_v49  ;;  %v2817_v40 = vxor.u32 %v810_v16, %v794_v15  ;;  %v2827_v50 = vxor.u32 %v812_v44, %v796_v53  ;;  %v2832_v38 = vxor.u32 %v814_v25, %v798_v57 }
 0x119   : > { %v615_v31 = vmax.f32 %v613_v52, %v614_v20  ;;  %v817_v20 = vshrl.u32 %v3717_v45, 13  ;;  %v820_v52 = vshrl.u32 %v3714_v32, 13  ;;  %v1029_v47 = vor.u32 1.1754944e-38, %v1028_v19 }
 0x11a   : > { %v2795_v8 = vpop.eup %2037  ;;  %v824_v45 = vshrl.u32 %v3774_v22, 13  ;;  %v2830_v24 = vxor.u32 %v813_v0, %v797_v30  ;;  %vm1142_vm8 = vweird.f32 %v2715_v11  ;;  %vm1143_vm9 = vweird.f32 %v2756_v29 }
 0x11b   : > { %v616_v27 = vrot.slane %v615_v31, 1  ;;  %v1148_v19 = vand.u32 2147483648, %v2715_v11  ;;  %vm2858_vm11 = vmor %vm1142_vm8, %vm1143_vm9  ;;  %v3786_v0 = vmul.u32 2246822507, %v2732_v61  ;;  %v3787_v21 = vmul.u32 2246822507, %v2734_v35 }
 0x11c   : > { %v3788_v42 = vmul.u32 2246822507, %v2736_v7  ;;  %v3789_v61 = vmul.u32 2246822507, %v2741_v54  ;;  %v3790_v35 = vmul.u32 2246822507, %v2743_v26  ;;  %vm1202_vm12 = vweird.f32 %v2745_v46 }
 0x11d   : > { %v2773_v13 = vmax.f32 %v615_v31, %v616_v27  ;;  %v2787_v31 = vshrl.u32 %v3773_v56, 13  ;;  %v1139_v27 = vsub.f32 1.0, %v1138_v5  ;;  %v1026_v56 = vand.u32 2147483647, %v2687_v63 }
 0x11e   : > { %v3775_v5 = vmul.u32 2246822507, %v2758_v23  ;;  %v2868_v25 = vxor.u32 %v817_v20, %v3787_v21  ;;  %v2888_v20 = vxor.u32 %v821_v59, %v3790_v35  ;;  %v2908_v26 = vor.u32 1.1754944e-38, %v1148_v19  ;;  %v3798_v21 = vld [vmem:[#allocation29_spill] sm:$0xff] }
 0x11f   : > { %v2791_v4 = vsub.f32 %v2575_v1, %v2773_v13  ;;  %v2799_v32 = vsub.f32 %v2582_v9, %v2773_v13  ;;  %v1021_v1 = vadd.f32 %v2721_v28, %v1020_v33  ;;  %v1081_v9 = vadd.f32 %v2726_v60, %v1080_v14 }
 0x120   : > { %v825_v41 = vshrl.u32 %v3775_v5, 13  ;;  %v1140_v22 = vmul.f32 %v2756_v29, %v1139_v27  ;;  %v1198_v5 = vmul.f32 %v2795_v8, %v2745_v46  ;;  %vm2837_vm7 = vcmp.eq.f32.partialorder %v1026_v56, 8.507059e+37 }
 0x121   : > { %v634_v63 = vmul.f32 1.442695, %v2791_v4  ;;  %v636_v14 = vmul.f32 1.442695, %v2799_v32  ;;  %v1025_v15 = vsel %vm2810_vm5, %v2721_v28, %v1021_v1  ;;  %v2845_v53 = vsub.f32 %v2586_v10, %v2773_v13 }
 0x122   : > { %v1085_v30 = vsel %vm2820_vm6, %v2726_v60, %v1081_v9  ;;  %v2855_v28 = vadd.f32 %v2756_v29, %v1140_v22  ;;  %v1199_v44 = vsub.f32 1.0, %v1198_v5  ;;  %v2864_v60 = vxor.u32 %v816_v62, %v3786_v0 }
 0x123   : > { %2039 = vpow2.f32 %v634_v63  ;;  %v2872_v27 = vxor.u32 %v818_v34, %v3788_v42  ;;  %v2876_v1 = vsub.f32 %v2595_v18, %v2773_v13  ;;  %v2880_v56 = vsel %vm2837_vm7, %v1029_v47, %v1025_v15 }
 0x124   : > { %2041 = vpow2.f32 %v636_v14  ;;  %v2884_v62 = vxor.u32 %v820_v52, %v3789_v61  ;;  %v2892_v7 = vsub.f32 %v2599_v36, %v2773_v13  ;;  %v638_v34 = vmul.f32 1.442695, %v2845_v53 }
 0x125   : > { %v2897_v18 = vsel %vm2850_vm10, %v1089_v51, %v1085_v30  ;;  %v2902_v54 = vsub.f32 %v2640_v48, %v2773_v13  ;;  %v2911_v36 = vmul.f32 %v2795_v8, %v1199_v44  ;;  %v2915_v52 = vsub.f32 %v2644_v58, %v2773_v13 }
 0x126   : > { %v2919_v9 = vsub.f32 %v2649_v2, %v2773_v13  ;;  %v2927_v22 = vsub.f32 %v2677_v55, %v2773_v13  ;;  %v2931_v5 = vsub.f32 %v2697_v17, %v2773_v13  ;;  %v640_v58 = vmul.f32 1.442695, %v2876_v1 }
 0x127   : > { %v3792_v14 = vmul.u32 2246822507, %v2749_v39  ;;  %v2943_v16 = vsub.f32 %v2578_v3, %v2773_v13  ;;  %2043 = vpow2.f32 %v638_v34  ;;  %v642_v55 = vmul.f32 1.442695, %v2892_v7 }
 0x128   : > { %v3793_v30 = vmul.u32 2246822507, %v2752_v49  ;;  %v2952_v57 = vsub.f32 %v2589_v12, %v2773_v13  ;;  %v2956_v39 = vsub.f32 %v2591_v37, %v2773_v13  ;;  %v3795_v3 = vmul.u32 2246822507, %v2758_v23 }
 0x129   : > { %v2923_v33 = vpop.eup %2039  ;;  %v2937_v2 = vxor.u32 %v2787_v31, %v3792_v14  ;;  %v644_v31 = vmul.f32 1.442695, %v2902_v54  ;;  %v2965_v19 = vsub.f32 %v2610_v43, %v2773_v13  ;;  %v2969_v49 = vsub.f32 %v2653_v6, %v2773_v13 }
 0x12a   : > { %3791 = vst [vmem:[#allocation30_spill] sm:$0xff] %v2923_v33  ;;  %v2939_v15 = vpop.eup %2041  ;;  %v2948_v17 = vxor.u32 %v824_v45, %v3793_v30  ;;  %v2961_v51 = vxor.u32 %v825_v41, %v3795_v3  ;;  %v646_v12 = vmul.f32 1.442695, %v2915_v52  ;;  %v648_v45 = vmul.f32 1.442695, %v2919_v9 }
 0x12b   : > { %3794 = vst [vmem:[#allocation31_spill] sm:$0xff] %v2956_v39  ;;  %2045 = vpow2.f32 %v640_v58  ;;  %v650_v37 = vmul.f32 1.442695, %v2927_v22  ;;  %v652_v44 = vmul.f32 1.442695, %v2931_v5  ;;  %v666_v41 = vadd.f32 %v2939_v15, %v2923_v33 }
 0x12c   : > { %3796 = vst [vmem:[#allocation32_spill] sm:$0xff] %v2965_v19  ;;  %2047 = vpow2.f32 %v642_v55  ;;  %v654_v43 = vmul.f32 1.442695, %v2943_v16  ;;  %v1519_v23 = vmul.f32 %v2923_v33, %v2791_v4  ;;  %v1520_v6 = vmul.f32 %v2939_v15, %v2799_v32 }
 0x12d   : > { %3797 = vst [vmem:[#allocation33_spill] sm:$0xff] %v2969_v49  ;;  %2049 = vpow2.f32 %v644_v31  ;;  %v656_v0 = vmul.f32 1.442695, %v2952_v57  ;;  %v2985_v42 = vsub.f32 %v3798_v21, %v2773_v13  ;;  %v842_v61 = vmul.u32 3266489909, %v2817_v40  ;;  %v2988_v35 = vpop.eup %2043 }
 0x12e   : > { %3800 = vst [vmem:[#allocation34_spill] sm:$0xff] %v2988_v35  ;;  %2051 = vpow2.f32 %v646_v12  ;;  %v658_v34 = vmul.f32 1.442695, %v2956_v39  ;;  %v844_v58 = vmul.u32 3266489909, %v2827_v50  ;;  %v667_v14 = vadd.f32 %v2988_v35, %v666_v41 }
 0x12f   : > { %3799 = vst [vmem:[#allocation29_spill] sm:$0xff] %v2985_v42  ;;  %v845_v4 = vmul.u32 3266489909, %v2830_v24  ;;  %2053 = vpow2.f32 %v648_v45  ;;  %v2994_v32 = vmul.f32 1.442695, %v2965_v19  ;;  %v1535_v55 = vadd.f32 %v1520_v6, %v1519_v23 }
 0x130   : > { %v846_v13 = vmul.u32 3266489909, %v2832_v38  ;;  %2055 = vpow2.f32 %v650_v37  ;;  %v2999_v40 = vmul.f32 1.442695, %v2969_v49  ;;  %v848_v30 = vmul.u32 3266489909, %v2864_v60 }
 0x131   : > { %v3002_v31 = vpop.eup %2045  ;;  %2057 = vpow2.f32 %v652_v44  ;;  %v3005_v50 = vmul.f32 1.442695, %v2985_v42  ;;  %v849_v24 = vmul.u32 3266489909, %v2868_v25  ;;  %v858_v3 = vshrl.u32 %v842_v61, 16 }
 0x132   : > { %3801 = vst [vmem:[#allocation35_spill] sm:$0xff] %v3002_v31  ;;  %v3008_v12 = vpop.eup %2047  ;;  %v1521_v38 = vmul.f32 %v2988_v35, %v2845_v53  ;;  %v850_v45 = vmul.u32 3266489909, %v2872_v27  ;;  %v860_v37 = vshrl.u32 %v844_v58, 16  ;;  %v861_v41 = vshrl.u32 %v845_v4, 16 }
 0x133   : > { %v3013_v23 = vpop.eup %2049  ;;  %2059 = vpow2.f32 %v654_v43  ;;  %v668_v60 = vadd.f32 %v3002_v31, %v667_v14  ;;  %v852_v44 = vmul.u32 3266489909, %v2884_v62  ;;  %v862_v6 = vshrl.u32 %v846_v13, 16 }
 0x134   : > { %v3017_v21 = vpop.eup %2051  ;;  %v1522_v25 = vmul.f32 %v3002_v31, %v2876_v1  ;;  %v1536_v59 = vadd.f32 %v1535_v55, %v1521_v38  ;;  %v853_v53 = vmul.u32 3266489909, %v2888_v20  ;;  %v864_v63 = vshrl.u32 %v848_v30, 16 }
 0x135   : > { %v3022_v27 = vpop.eup %2053  ;;  %2061 = vpow2.f32 %v656_v0  ;;  %v854_v48 = vmul.u32 3266489909, %v2937_v2  ;;  %v865_v43 = vshrl.u32 %v849_v24, 16  ;;  %v874_v47 = vxor.u32 %v858_v3, %v842_v61 }
 0x136   : > { %v3025_v14 = vpop.eup %2055  ;;  %v856_v62 = vmul.u32 3266489909, %v2948_v17  ;;  %v866_v42 = vshrl.u32 %v850_v45, 16  ;;  %v876_v49 = vxor.u32 %v860_v37, %v844_v58  ;;  %v877_v19 = vxor.u32 %v861_v41, %v845_v4 }
 0x137   : > { %v3028_v35 = vpop.eup %2057  ;;  %v669_v1 = vadd.f32 %v3008_v12, %v668_v60  ;;  %v857_v20 = vmul.u32 3266489909, %v2961_v51  ;;  %v868_v55 = vshrl.u32 %v852_v44, 16  ;;  %v878_v38 = vxor.u32 %v862_v6, %v846_v13 }
 0x138   : > { %v1523_v2 = vmul.f32 %v3008_v12, %v2892_v7  ;;  %v1537_v0 = vadd.f32 %v1536_v59, %v1522_v25  ;;  %v869_v61 = vshrl.u32 %v853_v53, 16  ;;  %v880_v3 = vxor.u32 %v864_v63, %v848_v30 }
 0x139   : > { %v3034_v31 = vpop.eup %2059  ;;  %2063 = vpow2.f32 %v658_v34  ;;  %v870_v17 = vshrl.u32 %v854_v48, 16  ;;  %v881_v58 = vxor.u32 %v865_v43, %v849_v24  ;;  %v890_v4 = vshrl.u32 %v874_v47, 9 }
 0x13a   : > { %v872_v37 = vshrl.u32 %v856_v62, 16  ;;  %v882_v41 = vxor.u32 %v866_v42, %v850_v45  ;;  %v892_v33 = vshrl.u32 %v876_v49, 9  ;;  %v893_v60 = vshrl.u32 %v877_v19, 9 }
 0x13b   : > { %v3036_v39 = vpop.eup %2061  ;;  %v670_v51 = vadd.f32 %v3013_v23, %v669_v1  ;;  %v873_v13 = vshrl.u32 %v857_v20, 16  ;;  %v884_v6 = vxor.u32 %v868_v55, %v852_v44  ;;  %v894_v7 = vshrl.u32 %v878_v38, 9 }
 0x13c   : > { %v1524_v59 = vmul.f32 %v3013_v23, %v2902_v54  ;;  %v1538_v63 = vadd.f32 %v1537_v0, %v1523_v2  ;;  %v885_v30 = vxor.u32 %v869_v61, %v853_v53  ;;  %v896_v34 = vshrl.u32 %v880_v3, 9 }
 0x13d   : > { %2065 = vpow2.f32 %v2994_v32  ;;  %v886_v47 = vxor.u32 %v870_v17, %v854_v48  ;;  %v897_v24 = vshrl.u32 %v881_v58, 9  ;;  %v906_v42 = vcvt.s32.f32 %v890_v4 }
 0x13e   : > { %v888_v49 = vxor.u32 %v872_v37, %v856_v62  ;;  %v898_v19 = vshrl.u32 %v882_v41, 9  ;;  %v908_v45 = vcvt.s32.f32 %v892_v33  ;;  %v909_v25 = vcvt.s32.f32 %v893_v60 }
 0x13f   : > { %v3042_v43 = vpop.eup %2063  ;;  %v671_v44 = vadd.f32 %v3017_v21, %v670_v51  ;;  %vm1203_vm13 = vweird.f32 %v2795_v8  ;;  %v889_v54 = vxor.u32 %v873_v13, %v857_v20  ;;  %v900_v53 = vshrl.u32 %v884_v6, 9 }
 0x140   : > { %v910_v1 = vcvt.s32.f32 %v894_v7  ;;  %v1525_v48 = vmul.f32 %v3017_v21, %v2915_v52  ;;  %v1539_v32 = vadd.f32 %v1538_v63, %v1524_v59  ;;  %v901_v55 = vshrl.u32 %v885_v30, 9  ;;  %vm3071_vm15 = vmor %vm1202_vm12, %vm1203_vm13 }
 0x141   : > { %v912_v62 = vcvt.s32.f32 %v896_v34  ;;  %2067 = vpow2.f32 %v2999_v40  ;;  %v902_v33 = vshrl.u32 %v886_v47, 9  ;;  %v913_v38 = vcvt.s32.f32 %v897_v24 }
 0x142   : > { %v922_v2 = vadd.f32 0.5, %v906_v42  ;;  %v904_v0 = vshrl.u32 %v888_v49, 9  ;;  %v914_v61 = vcvt.s32.f32 %v898_v19  ;;  %v924_v3 = vadd.f32 0.5, %v908_v45 }
 0x143   : > { %v925_v17 = vadd.f32 0.5, %v909_v25  ;;  %v3050_v58 = vpop.eup %2065  ;;  %v672_v20 = vadd.f32 %v3022_v27, %v671_v44  ;;  %v905_v4 = vshrl.u32 %v889_v54, 9  ;;  %v916_v37 = vcvt.s32.f32 %v900_v53 }
 0x144   : > { %v926_v41 = vadd.f32 0.5, %v910_v1  ;;  %v1526_v52 = vmul.f32 %v3022_v27, %v2919_v9  ;;  %v1540_v60 = vadd.f32 %v1539_v32, %v1525_v48  ;;  %v917_v51 = vcvt.s32.f32 %v901_v55 }
 0x145   : > { %v928_v40 = vadd.f32 0.5, %v912_v62  ;;  %v918_v13 = vcvt.s32.f32 %v902_v33  ;;  %v929_v6 = vadd.f32 0.5, %v913_v38  ;;  %v938_v7 = vmul.f32 1.1920929e-07, %v922_v2 }
 0x146   : > { %v940_v59 = vmul.f32 1.1920929e-07, %v924_v3  ;;  %2069 = vpow2.f32 %v3005_v50  ;;  %v920_v63 = vcvt.s32.f32 %v904_v0  ;;  %v930_v30 = vadd.f32 0.5, %v914_v61 }
 0x147   : > { %v941_v34 = vmul.f32 1.1920929e-07, %v925_v17  ;;  %v3056_v47 = vpop.eup %2067  ;;  %v673_v24 = vadd.f32 %v3025_v14, %v672_v20  ;;  %v3802_v42 = vand.u32 2147483647, %v2715_v11  ;;  %v921_v49 = vcvt.s32.f32 %v905_v4 }
 0x148   : > { %v932_v19 = vadd.f32 0.5, %v916_v37  ;;  %v942_v45 = vmul.f32 1.1920929e-07, %v926_v41  ;;  %v1541_v25 = vadd.f32 %v1540_v60, %v1526_v52  ;;  %v933_v44 = vadd.f32 0.5, %v917_v51 }
 0x149   : > { %vm3061_vm14 = vcmp.eq.f32.partialorder %v3802_v42, 8.507059e+37  ;;  %v944_v54 = vmul.f32 1.1920929e-07, %v928_v40  ;;  %2071 = vlog2.f32 %v938_v7  ;;  %v1201_v50 = vadd.f32 %v2795_v8, %v2911_v36 }
 0x14a   : > { %v934_v53 = vadd.f32 0.5, %v918_v13  ;;  %v945_v1 = vmul.f32 1.1920929e-07, %v929_v6  ;;  %2073 = vlog2.f32 %v940_v59  ;;  %v1527_v48 = vmul.f32 %v3025_v14, %v2927_v22 }
 0x14b   : > { %v936_v32 = vadd.f32 0.5, %v920_v63  ;;  %v946_v55 = vmul.f32 1.1920929e-07, %v930_v30  ;;  %2075 = vlog2.f32 %v941_v34  ;;  %v3807_v62 = vand.u32 2147483647, %v2745_v46 }
 0x14c   : > { %v937_v33 = vadd.f32 0.5, %v921_v49  ;;  %v948_v38 = vmul.f32 1.1920929e-07, %v932_v19  ;;  %2077 = vlog2.f32 %v942_v45  ;;  %v3083_v2 = vpop.eup %2069  ;;  %v674_v0 = vadd.f32 %v3028_v35, %v673_v24 }
 0x14d   : > { %vm3079_vm0 = vcmp.eq.f32.partialorder %v3807_v62, 8.507059e+37  ;;  %v1542_v61 = vadd.f32 %v1541_v25, %v1527_v48  ;;  %v949_v3 = vmul.f32 1.1920929e-07, %v933_v44  ;;  %2079 = vlog2.f32 %v944_v54  ;;  %v3812_v48 = vld [vmem:[#allocation31_spill] sm:$0xff] }
 0x14e   : > { %v1205_v22 = vsel %vm3071_vm15, %v2795_v8, %v1201_v50  ;;  %v3810_v17 = vand.u32 2147483648, %v2745_v46  ;;  %v950_v4 = vmul.f32 1.1920929e-07, %v934_v53  ;;  %2081 = vlog2.f32 %v945_v1 }
 0x14f   : > { %v2072_v37 = vpop.eup %2071  ;;  %v3093_v41 = vmul.f32 %v2939_v15, %v2880_v56  ;;  %v1528_v52 = vmul.f32 %v3028_v35, %v2931_v5  ;;  %v952_v60 = vmul.f32 1.1920929e-07, %v936_v32  ;;  %2083 = vlog2.f32 %v946_v55 }
 0x150   : > { %v1209_v20 = vor.u32 1.1754944e-38, %v3810_v17  ;;  %v2074_v51 = vpop.eup %2073  ;;  %v3099_v40 = vmul.f32 %v3013_v23, %v2897_v18  ;;  %v953_v8 = vmul.f32 1.1920929e-07, %v937_v33  ;;  %v955_v46 = vmul.f32 0.6931472, %v2072_v37 }
 0x151   : > { %2085 = vlog2.f32 %v948_v38  ;;  %v2076_v13 = vpop.eup %2075  ;;  %v675_v6 = vadd.f32 %v3034_v31, %v674_v0  ;;  %v1543_v7 = vadd.f32 %v1542_v61, %v1528_v52  ;;  %v959_v59 = vmul.f32 0.6931472, %v2074_v51 }
 0x152   : > { %2087 = vlog2.f32 %v949_v3  ;;  %v2078_v56 = vpop.eup %2077  ;;  %v961_v15 = vmul.f32 0.6931472, %v2076_v13  ;;  %v3102_v5 = vsub.f32 0.0, %v955_v46  ;;  %v3811_v18 = vsel %vm2858_vm11, %v2756_v29, %v2855_v28 }
 0x153   : > { %2089 = vlog2.f32 %v950_v4  ;;  %v2080_v63 = vpop.eup %2079  ;;  %v1150_v23 = vsel %vm3061_vm14, %v2908_v26, %v3811_v18  ;;  %v1529_v30 = vmul.f32 %v3034_v31, %v2943_v16  ;;  %v3114_v34 = vsub.f32 0.0, %v959_v59 }
 0x154   : > { %2091 = vlog2.f32 %v952_v60  ;;  %v2082_v24 = vpop.eup %2081  ;;  %v1210_v42 = vsel %vm3079_vm0, %v1209_v20, %v1205_v22  ;;  %v1243_v10 = vmax.f32 %v3093_v41, %v3099_v40  ;;  %v676_v29 = vadd.f32 %v3036_v39, %v675_v6 }
 0x155   : > { %2093 = vlog2.f32 %v953_v8  ;;  %v2084_v49 = vpop.eup %2083  ;;  %v1544_v28 = vadd.f32 %v1543_v7, %v1529_v30  ;;  %v3121_v9 = vsub.f32 0.0, %v961_v15  ;;  %v3125_v16 = vmul.f32 %v3028_v35, %v1150_v23 }
 0x156   : > { %2095 = vrcp.f32 %v3102_v5  ;;  %v963_v19 = vmul.f32 0.6931472, %v2078_v56  ;;  %v1530_v25 = vmul.f32 %v3036_v39, %v2952_v57  ;;  %v967_v44 = vmul.f32 0.6931472, %v2080_v63 }
 0x157   : > { %v2086_v26 = vpop.eup %2085  ;;  %2097 = vrcp.f32 %v3114_v34  ;;  %v969_v54 = vmul.f32 0.6931472, %v2082_v24  ;;  %v971_v50 = vmul.f32 0.6931472, %v2084_v49  ;;  %v3131_v1 = vmul.f32 %v3050_v58, %v1210_v42 }
 0x158   : > { %v2088_v45 = vpop.eup %2087  ;;  %v3134_v11 = vmax.f32 %v1243_v10, %v3125_v16  ;;  %v3138_v35 = vmul.f32 %v3042_v43, %v3812_v48  ;;  %v1013_v32 = vand.u32 2147483648, %v3102_v5  ;;  %v3142_v62 = vadd.f32 %v3042_v43, %v676_v29  ;;  %v3833_v48 = vld [vmem:[#allocation30_spill] sm:$0xff] }
 0x159   : > { %v2090_v53 = vpop.eup %2089  ;;  %v3144_v57 = vadd.f32 %v1544_v28, %v1530_v25  ;;  %v975_v36 = vmul.f32 0.6931472, %v2086_v26  ;;  %2099 = vrcp.f32 %v3121_v9  ;;  %v977_v38 = vmul.f32 0.6931472, %v2088_v45 }
 0x15a   : > { %v2092_v55 = vpop.eup %2091  ;;  %v3147_v0 = vsub.f32 0.0, %v963_v19  ;;  %vm1007_vm1 = vweird.f32 %v3102_v5  ;;  %v1011_v61 = vand.u32 2147483647, %v3102_v5  ;;  %v3153_v22 = vsub.f32 0.0, %v967_v44 }
 0x15b   : > { %v2094_v33 = vpop.eup %2093  ;;  %v3155_v17 = vsub.f32 0.0, %v969_v54  ;;  %v3157_v20 = vsub.f32 0.0, %v971_v50  ;;  %vm1037_vm2 = vweird.f32 %v3114_v34  ;;  %v979_v37 = vmul.f32 0.6931472, %v2090_v53 }
 0x15c   : > { %v3151_v3 = vpop.eup %2095  ;;  %v3164_v60 = vor.u32 1.1754944e-38, %v1013_v32  ;;  %v1041_v51 = vand.u32 2147483647, %v3114_v34  ;;  %v983_v8 = vmul.f32 0.6931472, %v2092_v55  ;;  %v3167_v46 = vsub.f32 0.0, %v975_v36 }
 0x15d   : > { %v3160_v4 = vpop.eup %2097  ;;  %v1003_v52 = vmul.f32 %v3151_v3, %v3102_v5  ;;  %v1043_v6 = vand.u32 2147483648, %v3114_v34  ;;  %v3172_v7 = vsub.f32 0.0, %v977_v38  ;;  %vm1052_vm3 = vweird.f32 %v3121_v9  ;;  %v3834_v38 = vld [vmem:[#allocation34_spill] sm:$0xff] }
 0x15e   : > { %v1033_v13 = vmul.f32 %v3160_v4, %v3114_v34  ;;  %2101 = vrcp.f32 %v3147_v0  ;;  %v985_v15 = vmul.f32 0.6931472, %v2094_v33  ;;  %vm3178_vm4 = vcmp.eq.f32.partialorder %v1011_v61, 8.507059e+37 }
 0x15f   : > { %v1004_v59 = vsub.f32 1.0, %v1003_v52  ;;  %v3176_v56 = vpop.eup %2099  ;;  %v1056_v23 = vand.u32 2147483647, %v3121_v9  ;;  %2103 = vrcp.f32 %v3153_v22  ;;  %v3184_v30 = vsub.f32 0.0, %v979_v37 }
 0x160   : > { %v1034_v18 = vsub.f32 1.0, %v1033_v13  ;;  %vm3187_vm5 = vcmp.eq.f32.partialorder %v1041_v51, 8.507059e+37  ;;  %v1048_v10 = vmul.f32 %v3176_v56, %v3121_v9  ;;  %v1058_v49 = vand.u32 2147483648, %v3121_v9  ;;  %v3839_v13 = vld [vmem:[#allocation35_spill] sm:$0xff] }
 0x161   : > { %v1005_v24 = vmul.f32 %v3151_v3, %v1004_v59  ;;  %vm1008_vm6 = vweird.f32 %v3151_v3  ;;  %vm1038_vm7 = vweird.f32 %v3160_v4  ;;  %v1044_v28 = vor.u32 1.1754944e-38, %v1043_v6 }
 0x162   : > { %v1035_v29 = vmul.f32 %v3160_v4, %v1034_v18  ;;  %v1049_v26 = vsub.f32 1.0, %v1048_v10  ;;  %v1071_v19 = vand.u32 2147483647, %v3147_v0  ;;  %v1073_v45 = vand.u32 2147483648, %v3147_v0  ;;  %vm3213_vm9 = vmor %vm1007_vm1, %vm1008_vm6 }
 0x163   : > { %2105 = vrcp.f32 %v3155_v17  ;;  %v3200_v25 = vsub.f32 0.0, %v983_v8  ;;  %v3202_v44 = vsub.f32 0.0, %v985_v15  ;;  %v1006_v54 = vadd.f32 %v3151_v3, %v1005_v24  ;;  %vm3224_vm11 = vmor %vm1037_vm2, %vm1038_vm7 }
 0x164   : > { %vm3205_vm8 = vcmp.eq.f32.partialorder %v1056_v23, 8.507059e+37  ;;  %v3209_v53 = vpop.eup %2101  ;;  %v1036_v32 = vadd.f32 %v3160_v4, %v1035_v29  ;;  %v1050_v55 = vmul.f32 %v3176_v56, %v1049_v26  ;;  %vm1053_vm10 = vweird.f32 %v3176_v56 }
 0x165   : > { %v1059_v36 = vor.u32 1.1754944e-38, %v1058_v49  ;;  %v2104_v33 = vpop.eup %2103  ;;  %v1063_v5 = vmul.f32 %v3209_v53, %v3147_v0  ;;  %vm1067_vm12 = vweird.f32 %v3147_v0  ;;  %vm1097_vm13 = vweird.f32 %v3153_v22  ;;  %vm3244_vm15 = vmor %vm1052_vm3, %vm1053_vm10 }
 0x166   : > { %v1101_v61 = vand.u32 2147483647, %v3153_v22  ;;  %v1051_v37 = vadd.f32 %v3176_v56, %v1050_v55  ;;  %vm3234_vm14 = vcmp.eq.f32.partialorder %v1071_v19, 8.507059e+37  ;;  %v1074_v34 = vor.u32 1.1754944e-38, %v1073_v45 }
 0x167   : > { %v1093_v51 = vmul.f32 %v2104_v33, %v3153_v22  ;;  %v1010_v8 = vsel %vm3213_vm9, %v3151_v3, %v1006_v54  ;;  %v1064_v6 = vsub.f32 1.0, %v1063_v5  ;;  %vm1068_vm0 = vweird.f32 %v3209_v53 }
 0x168   : > { %v1103_v59 = vand.u32 2147483648, %v3153_v22  ;;  %v1040_v18 = vsel %vm3224_vm11, %v3160_v4, %v1036_v32  ;;  %vm1098_vm1 = vweird.f32 %v2104_v33  ;;  %2107 = vrcp.f32 %v3157_v20  ;;  %vm3269_vm6 = vmor %vm1067_vm12, %vm1068_vm0 }
 0x169   : > { %v2106_v15 = vpop.eup %2105  ;;  %v1094_v23 = vsub.f32 1.0, %v1093_v51  ;;  %v1065_v9 = vmul.f32 %v3209_v53, %v1064_v6  ;;  %vm3255_vm2 = vcmp.eq.f32.partialorder %v1101_v61, 8.507059e+37  ;;  %vm1112_vm3 = vweird.f32 %v3155_v17 }
 0x16a   : > { %v1108_v24 = vmul.f32 %v2106_v15, %v3155_v17  ;;  %v1015_v10 = vsel %vm3178_vm4, %v3164_v60, %v1010_v8  ;;  %v1055_v4 = vsel %vm3244_vm15, %v3176_v56, %v1051_v37  ;;  %v1116_v26 = vand.u32 2147483647, %v3155_v17  ;;  %vm3279_vm4 = vmor %vm1097_vm13, %vm1098_vm1 }
 0x16b   : > { %v1095_v29 = vmul.f32 %v2104_v33, %v1094_v23  ;;  %v1045_v19 = vsel %vm3187_vm5, %v1044_v28, %v1040_v18  ;;  %v1066_v45 = vadd.f32 %v3209_v53, %v1065_v9  ;;  %2109 = vrcp.f32 %v3167_v46 }
 0x16c   : > { %v1109_v56 = vsub.f32 1.0, %v1108_v24  ;;  %vm1113_vm7 = vweird.f32 %v2106_v15  ;;  %v1118_v63 = vand.u32 2147483648, %v3155_v17  ;;  %v1131_v54 = vand.u32 2147483647, %v3157_v20 }
 0x16d   : > { %v1096_v0 = vadd.f32 %v2104_v33, %v1095_v29  ;;  %v3287_v42 = vmul.f32 %v3833_v48, %v1015_v10  ;;  %v1060_v28 = vsel %vm3205_vm8, %v1059_v36, %v1055_v4  ;;  %v1104_v22 = vor.u32 1.1754944e-38, %v1103_v59  ;;  %vm3304_vm5 = vmor %vm1112_vm3, %vm1113_vm7 }
 0x16e   : > { %v1110_v32 = vmul.f32 %v2106_v15, %v1109_v56  ;;  %v3291_v55 = vpop.eup %2107  ;;  %v3294_v5 = vmul.f32 %v3834_v38, %v1045_v19  ;;  %v1070_v61 = vsel %vm3269_vm6, %v3209_v53, %v1066_v45  ;;  %2111 = vrcp.f32 %v3172_v7 }
 0x16f   : > { %v1100_v37 = vsel %vm3279_vm4, %v2104_v33, %v1096_v0  ;;  %vm3308_vm8 = vcmp.eq.f32.partialorder %v1116_v26, 8.507059e+37  ;;  %v1123_v8 = vmul.f32 %v3291_v55, %v3157_v20  ;;  %v1133_v53 = vand.u32 2147483648, %v3157_v20 }
 0x170   : > { %v1111_v51 = vadd.f32 %v2106_v15, %v1110_v32  ;;  %v3316_v33 = vmul.f32 %v3839_v13, %v1060_v28  ;;  %v1119_v6 = vor.u32 1.1754944e-38, %v1118_v63  ;;  %vm1127_vm9 = vweird.f32 %v3157_v20 }
 0x171   : > { %vm3319_vm10 = vcmp.eq.f32.partialorder %v1131_v54, 8.507059e+37  ;;  %v3323_v59 = vpop.eup %2109  ;;  %v1075_v18 = vsel %vm3234_vm14, %v1074_v34, %v1070_v61  ;;  %v1105_v23 = vsel %vm3255_vm2, %v1104_v22, %v1100_v37  ;;  %v1124_v9 = vsub.f32 1.0, %v1123_v8 }
 0x172   : > { %v1161_v24 = vand.u32 2147483647, %v3167_v46  ;;  %v1115_v10 = vsel %vm3304_vm5, %v2106_v15, %v1111_v51  ;;  %vm1128_vm11 = vweird.f32 %v3291_v55  ;;  %v1153_v4 = vmul.f32 %v3323_v59, %v3167_v46 }
 0x173   : > { %2113 = vrcp.f32 %v3184_v30  ;;  %v1125_v49 = vmul.f32 %v3291_v55, %v1124_v9  ;;  %v1134_v52 = vor.u32 1.1754944e-38, %v1133_v53  ;;  %vm1157_vm12 = vweird.f32 %v3167_v46  ;;  %vm3351_vm13 = vmor %vm1127_vm9, %vm1128_vm11 }
 0x174   : > { %v1163_v34 = vand.u32 2147483648, %v3167_v46  ;;  %v2112_v3 = vpop.eup %2111  ;;  %v3340_v29 = vmul.f32 %v3008_v12, %v1075_v18  ;;  %v3343_v15 = vmul.f32 %v3017_v21, %v1105_v23  ;;  %v1154_v26 = vsub.f32 1.0, %v1153_v4 }
 0x175   : > { %v1176_v19 = vand.u32 2147483647, %v3172_v7  ;;  %v1120_v45 = vsel %vm3308_vm8, %v1119_v6, %v1115_v10  ;;  %v1126_v60 = vadd.f32 %v3291_v55, %v1125_v49  ;;  %vm3355_vm14 = vcmp.eq.f32.partialorder %v1161_v24, 8.507059e+37 }
 0x176   : > { %v1168_v21 = vmul.f32 %v2112_v3, %v3172_v7  ;;  %2115 = vrcp.f32 %v3200_v25  ;;  %v1155_v0 = vmul.f32 %v3323_v59, %v1154_v26  ;;  %vm1158_vm15 = vweird.f32 %v3323_v59 }
 0x177   : > { %v1178_v63 = vand.u32 2147483648, %v3172_v7  ;;  %v1191_v20 = vand.u32 2147483647, %v3184_v30  ;;  %v1164_v54 = vor.u32 1.1754944e-38, %v1163_v34  ;;  %vm1172_vm0 = vweird.f32 %v3172_v7  ;;  %vm3377_vm2 = vmor %vm1157_vm12, %vm1158_vm15 }
 0x178   : > { %v1169_v48 = vsub.f32 1.0, %v1168_v21  ;;  %vm1173_vm1 = vweird.f32 %v2112_v3  ;;  %v3367_v22 = vmul.f32 %v3022_v27, %v1120_v45  ;;  %v1130_v32 = vsel %vm3351_vm13, %v3291_v55, %v1126_v60 }
 0x179   : > { %v2114_v28 = vpop.eup %2113  ;;  %v1193_v38 = vand.u32 2147483648, %v3184_v30  ;;  %2117 = vrcp.f32 %v3202_v44  ;;  %v1156_v61 = vadd.f32 %v3323_v59, %v1155_v0  ;;  %vm3381_vm3 = vcmp.eq.f32.partialorder %v1176_v19, 8.507059e+37  ;;  %vm3386_vm6 = vmor %vm1172_vm0, %vm1173_vm1  ;;  %v3863_v0 = vld [vmem:[#allocation13_spill] sm:$0xff] }
 0x17a   : > { %v1170_v7 = vmul.f32 %v2112_v3, %v1169_v48  ;;  %v1183_v51 = vmul.f32 %v2114_v28, %v3184_v30  ;;  %v1179_v50 = vor.u32 1.1754944e-38, %v1178_v63  ;;  %vm1187_vm4 = vweird.f32 %v3184_v30 }
 0x17b   : > { %vm3391_vm7 = vcmp.eq.f32.partialorder %v1191_v20, 8.507059e+37  ;;  %v1223_v36 = vand.u32 2147483648, %v3200_v25  ;;  %v1135_v53 = vsel %vm3319_vm10, %v1134_v52, %v1130_v32  ;;  %vm1188_vm5 = vweird.f32 %v2114_v28 }
 0x17c   : > { %v2116_v8 = vpop.eup %2115  ;;  %v1171_v13 = vadd.f32 %v2112_v3, %v1170_v7  ;;  %v1184_v6 = vsub.f32 1.0, %v1183_v51  ;;  %v1194_v18 = vor.u32 1.1754944e-38, %v1193_v38  ;;  %vm1217_vm8 = vweird.f32 %v3200_v25  ;;  %vm3412_vm10 = vmor %vm1187_vm4, %vm1188_vm5 }
 0x17d   : > { %v1213_v23 = vmul.f32 %v2116_v8, %v3200_v25  ;;  %v1221_v9 = vand.u32 2147483647, %v3200_v25  ;;  %v1160_v24 = vsel %vm3377_vm2, %v3323_v59, %v1156_v61  ;;  %vm1232_vm9 = vweird.f32 %v3202_v44 }
 0x17e   : > { %v1175_v10 = vsel %vm3386_vm6, %v2112_v3, %v1171_v13  ;;  %v1185_v4 = vmul.f32 %v2114_v28, %v1184_v6  ;;  %v3408_v49 = vmul.f32 %v3025_v14, %v1135_v53  ;;  %vm1218_vm11 = vweird.f32 %v2116_v8 }
 0x17f   : > { %v2118_v17 = vpop.eup %2117  ;;  %v1214_v34 = vsub.f32 1.0, %v1213_v23  ;;  %v1224_v26 = vor.u32 1.1754944e-38, %v1223_v36  ;;  %v1236_v3 = vand.u32 2147483647, %v3202_v44  ;;  %v1242_v45 = vmax.f32 %v3287_v42, %v3340_v29  ;;  %vm3429_vm12 = vmor %vm1217_vm8, %vm1218_vm11 }
 0x180   : > { %v1186_v59 = vadd.f32 %v2114_v28, %v1185_v4  ;;  %v1228_v19 = vmul.f32 %v2118_v17, %v3202_v44  ;;  %v1165_v14 = vsel %vm3355_vm14, %v1164_v54, %v1160_v24  ;;  %v1180_v30 = vsel %vm3381_vm3, %v1179_v50, %v1175_v10 }
 0x181   : > { %v1215_v60 = vmul.f32 %v2116_v8, %v1214_v34  ;;  %v1238_v56 = vand.u32 2147483648, %v3202_v44  ;;  %vm1233_vm13 = vweird.f32 %v2118_v17  ;;  %v1244_v12 = vmax.f32 %v3294_v5, %v3343_v15  ;;  %v3860_v44 = vld [vmem:[#allocation32_spill] sm:$0xff] }
 0x182   : > { %v1190_v21 = vsel %vm3412_vm10, %v2114_v28, %v1186_v59  ;;  %v1229_v63 = vsub.f32 1.0, %v1228_v19  ;;  %v1546_v20 = vadd.f32 %v3144_v57, %v3138_v35  ;;  %vm1222_vm14 = vcmp.eq.f32.partialorder %v1221_v9, 8.507059e+37  ;;  %vm3452_vm15 = vmor %vm1232_vm9, %vm1233_vm13  ;;  %v3867_v57 = vld [vmem:[#allocation20_spill] sm:$0xff] }
 0x183   : > { %v1195_v54 = vsel %vm3391_vm7, %v1194_v18, %v1190_v21  ;;  %v1216_v48 = vadd.f32 %v2116_v8, %v1215_v60  ;;  %v3440_v28 = vmul.f32 %v3034_v31, %v1165_v14  ;;  %v1245_v32 = vmax.f32 %v3316_v33, %v3367_v22 }
 0x184   : > { %v1230_v25 = vmul.f32 %v2118_v17, %v1229_v63  ;;  %v1246_v38 = vmax.f32 %v1242_v45, %v3408_v49  ;;  %v3446_v61 = vmul.f32 %v3036_v39, %v1180_v30  ;;  %vm1237_vm0 = vcmp.eq.f32.partialorder %v1236_v3, 8.507059e+37 }
 0x185   : > { %v1220_v35 = vsel %vm3429_vm12, %v2116_v8, %v1216_v48  ;;  %v1239_v31 = vor.u32 1.1754944e-38, %v1238_v56  ;;  %v3457_v37 = vmul.f32 %v3042_v43, %v1195_v54  ;;  %v1248_v51 = vmax.f32 %v1244_v12, %v3440_v28  ;;  %v3864_v12 = vld [vmem:[#allocation14_spill] sm:$0xff] }
 0x186   : > { %v1225_v7 = vsel %vm1222_vm14, %v1224_v26, %v1220_v35  ;;  %v1231_v27 = vadd.f32 %v2118_v17, %v1230_v25  ;;  %v678_v39 = vadd.f32 %v3050_v58, %v3142_v62  ;;  %v1251_v55 = vmax.f32 %v3134_v11, %v3131_v1  ;;  %v3865_v25 = vld [vmem:[#allocation18_spill] sm:$0xff] }
 0x187   : > { %v1532_v50 = vmul.f32 %v3050_v58, %v3860_v44  ;;  %v3467_v46 = vmul.f32 %v3056_v47, %v1225_v7  ;;  %v1249_v36 = vmax.f32 %v1245_v32, %v3446_v61  ;;  %v1250_v8 = vmax.f32 %v1246_v38, %v3457_v37  ;;  %v3861_v58 = vld [vmem:[#allocation33_spill] sm:$0xff]  ;;  %v3866_v32 = vld [vmem:[#allocation19_spill] sm:$0xff] }
 0x188   : > { %v1235_v43 = vsel %vm3452_vm15, %v2118_v17, %v1231_v27  ;;  %v679_v6 = vadd.f32 %v3056_v47, %v678_v39  ;;  %v1533_v18 = vmul.f32 %v3056_v47, %v3861_v58  ;;  %v3862_v17 = vld [vmem:[#allocation29_spill] sm:$0xff]  ;;  %v1279_v63 = vcvt.s32.f32 %v3863_v0  ;;  %v3868_v7 = vld [vmem:[#allocation15_spill] sm:$0xff] }
 0x189   : > { %v1547_v53 = vadd.f32 %v1546_v20, %v1532_v50  ;;  %v1240_v13 = vsel %vm1237_vm0, %v1239_v31, %v1235_v43  ;;  %v1252_v11 = vmax.f32 %v1248_v51, %v3467_v46  ;;  %v1254_v9 = vmax.f32 %v1250_v8, %v1251_v55  ;;  %v3869_v51 = vld [vmem:[#allocation21_spill] sm:$0xff]  ;;  %v3870_v50 = vld [vmem:[#allocation22_spill] sm:$0xff] }
 0x18a   : > { %v3474_v62 = vmul.f32 %v3083_v2, %v1240_v13  ;;  %v680_v4 = vadd.f32 %v3083_v2, %v679_v6  ;;  %v1534_v52 = vmul.f32 %v3083_v2, %v3862_v17  ;;  %v1280_v20 = vcvt.s32.f32 %v3864_v12  ;;  %v3874_v58 = vld [vmem:[#allocation25_spill] sm:$0xff] }
 0x18b   : > { %v1548_v24 = vadd.f32 %v1547_v53, %v1533_v18  ;;  %v1281_v2 = vcvt.s32.f32 %v3865_v25  ;;  %v1282_v38 = vcvt.s32.f32 %v3866_v32  ;;  %v1283_v31 = vcvt.s32.f32 %v3867_v57  ;;  %v3872_v53 = vld [vmem:[#allocation16_spill] sm:$0xff] }
 0x18c   : > { %v1253_v23 = vmax.f32 %v1249_v36, %v3474_v62  ;;  %v681_v26 = vrot.slane %v680_v4, 4  ;;  %v1284_v27 = vcvt.s32.f32 %v3868_v7  ;;  %v1285_v39 = vcvt.s32.f32 %v3869_v51  ;;  %v3871_v36 = vld [vmem:[#allocation23_spill] sm:$0xff] }
 0x18d   : > { %v1549_v59 = vadd.f32 %v1548_v24, %v1534_v52  ;;  %v1286_v43 = vcvt.s32.f32 %v3870_v50  ;;  %v1287_v8 = vcvt.s32.f32 %v3871_v36  ;;  %v1288_v13 = vcvt.s32.f32 %v3872_v53  ;;  %v3876_v24 = vld [vmem:[#allocation17_spill] sm:$0xff]  ;;  %v3878_v52 = vld [vmem:[#allocation28_spill] sm:$0xff] }
 0x18e   : > { %v1255_v10 = vmax.f32 %v1252_v11, %v1253_v23  ;;  %v682_v3 = vadd.f32 %v681_v26, %v680_v4  ;;  %v3873_v11 = vld [vmem:[#allocation24_spill] sm:$0xff]  ;;  %v1290_v18 = vcvt.s32.f32 %v3874_v58  ;;  %v3875_v23 = vld [vmem:[#allocation26_spill] sm:$0xff]  ;;  %v3877_v4 = vld [vmem:[#allocation27_spill] sm:$0xff] }
 0x18f   : > { %v1550_v45 = vrot.slane %v1549_v59, 4  ;;  %v1289_v6 = vcvt.s32.f32 %v3873_v11  ;;  %v1293_v17 = vcvt.s32.f32 %v3877_v4 }
 0x190   : > { %v1256_v34 = vmax.f32 %v1254_v9, %v1255_v10  ;;  %v683_v30 = vrot.slane %v682_v3, 2  ;;  %v1291_v9 = vcvt.s32.f32 %v3875_v23  ;;  %v1292_v10 = vcvt.s32.f32 %v3876_v24 }
 0x191   : > { %v1551_v47 = vadd.f32 %v1550_v45, %v1549_v59 }
 0x192   : > { %v1257_v19 = vrot.slane %v1256_v34, 4  ;;  %v684_v56 = vadd.f32 %v683_v30, %v682_v3 }
 0x193   : > { %v1552_v35 = vrot.slane %v1551_v47, 2 }
 0x194   : > { %v1258_v14 = vmax.f32 %v1256_v34, %v1257_v19  ;;  %v685_v54 = vrot.slane %v684_v56, 1  ;;  %v1294_v34 = vcvt.s32.f32 %v3878_v52 }
 0x195   : > { %v3502_v26 = vadd.f32 %v1552_v35, %v1551_v47 }
 0x196   : > { %v1259_v60 = vrot.slane %v1258_v14, 2  ;;  %v3491_v55 = vadd.f32 %v685_v54, %v684_v56 }
 0x198   : > { %v1260_v21 = vmax.f32 %v1258_v14, %v1259_v60  ;;  %2119 = vrcp.f32 %v3491_v55 }
 0x199   : > { %2121 = vlog2.f32 %v3491_v55 }
 0x19a   : > { %v1261_v48 = vrot.slane %v1260_v21, 1 }
 0x19c   : > { %v1262_v44 = vmax.f32 %v1260_v21, %v1261_v48 }
 0x19e   : > { %vm1263_vm1 = vcmp.eq.f32.partialorder %v3287_v42, %v1262_v44  ;;  %vm1264_vm2 = vcmp.eq.f32.partialorder %v3093_v41, %v1262_v44  ;;  %vm1265_vm3 = vcmp.eq.f32.partialorder %v3294_v5, %v1262_v44  ;;  %vm1266_vm6 = vcmp.eq.f32.partialorder %v3316_v33, %v1262_v44  ;;  %v2120_v3 = vpop.eup %2119 }
 0x19f   : > { %vm1267_vm4 = vcmp.eq.f32.partialorder %v3340_v29, %v1262_v44  ;;  %vm1268_vm7 = vcmp.eq.f32.partialorder %v3099_v40, %v1262_v44  ;;  %vm1269_vm5 = vcmp.eq.f32.partialorder %v3343_v15, %v1262_v44  ;;  %vm1270_vm8 = vcmp.eq.f32.partialorder %v3367_v22, %v1262_v44 }
 0x1a0   : > { %vm1271_vm9 = vcmp.eq.f32.partialorder %v3408_v49, %v1262_v44  ;;  %vm1272_vm10 = vcmp.eq.f32.partialorder %v3125_v16, %v1262_v44  ;;  %vm1273_vm11 = vcmp.eq.f32.partialorder %v3440_v28, %v1262_v44  ;;  %vm1274_vm12 = vcmp.eq.f32.partialorder %v3446_v61, %v1262_v44 }
 0x1a1   : > { %v1295_v41 = vsel %vm1263_vm1, %v1279_v63, 128.0  ;;  %v1296_v42 = vsel %vm1264_vm2, %v1280_v20, 128.0  ;;  %v1297_v5 = vsel %vm1265_vm3, %v1281_v2, 128.0  ;;  %v1298_v33 = vsel %vm1266_vm6, %v1282_v38, 128.0 }
 0x1a2   : > { %v1299_v59 = vsel %vm1267_vm4, %v1283_v31, 128.0  ;;  %v1300_v29 = vsel %vm1268_vm7, %v1284_v27, 128.0  ;;  %v1301_v19 = vsel %vm1269_vm5, %v1285_v39, 128.0  ;;  %v1302_v40 = vsel %vm1270_vm8, %v1286_v43, 128.0 }
 0x1a3   : > { %vm1275_vm13 = vcmp.eq.f32.partialorder %v3457_v37, %v1262_v44  ;;  %vm1276_vm14 = vcmp.eq.f32.partialorder %v3131_v1, %v1262_v44  ;;  %vm1277_vm15 = vcmp.eq.f32.partialorder %v3467_v46, %v1262_v44  ;;  %vm1278_vm0 = vcmp.eq.f32.partialorder %v3474_v62, %v1262_v44 }
 0x1a4   : > { %v1303_v15 = vsel %vm1271_vm9, %v1287_v8, 128.0  ;;  %v1304_v22 = vsel %vm1272_vm10, %v1288_v13, 128.0  ;;  %v1305_v45 = vsel %vm1273_vm11, %v1289_v6, 128.0  ;;  %v1306_v14 = vsel %vm1274_vm12, %v1290_v18, 128.0  ;;  %v2122_v6 = vpop.eup %2121 }
 0x1a5   : > { %v1311_v30 = vmin.f32 %v1295_v41, %v1299_v59  ;;  %v1312_v37 = vmin.f32 %v1296_v42, %v1300_v29  ;;  %v1313_v60 = vmin.f32 %v1297_v5, %v1301_v19  ;;  %v1314_v1 = vmin.f32 %v1298_v33, %v1302_v40 }
 0x1a6   : > { %v1307_v47 = vsel %vm1275_vm13, %v1291_v9, 128.0  ;;  %v1308_v46 = vsel %vm1276_vm14, %v1292_v10, 128.0  ;;  %v1309_v56 = vsel %vm1277_vm15, %v1293_v17, 128.0  ;;  %v1557_v21 = vmul.f32 %v2120_v3, %v3491_v55 }
 0x1a7   : > { %v1315_v49 = vmin.f32 %v1311_v30, %v1303_v15  ;;  %v1316_v63 = vmin.f32 %v1312_v37, %v1304_v22  ;;  %v1317_v20 = vmin.f32 %v1313_v60, %v1305_v45  ;;  %v1318_v16 = vmin.f32 %v1314_v1, %v1306_v14 }
 0x1a8   : > { %v1310_v28 = vsel %vm1278_vm0, %v1294_v34, 128.0  ;;  %v1558_v54 = vsub.f32 1.0, %v1557_v21  ;;  %v1567_v61 = vand.u32 2147483648, %v3491_v55  ;;  %v1554_v31 = vrot.slane %v3502_v26, 1 }
 0x1a9   : > { %v1319_v48 = vmin.f32 %v1315_v49, %v1307_v47  ;;  %v1320_v2 = vmin.f32 %v1316_v63, %v1308_v46  ;;  %v1321_v38 = vmin.f32 %v1317_v20, %v1309_v56  ;;  %v1322_v35 = vmin.f32 %v1318_v16, %v1310_v28 }
 0x1aa   : > { %v1559_v27 = vmul.f32 %v2120_v3, %v1558_v54  ;;  %vm1562_vm1 = vweird.f32 %v2120_v3  ;;  %v1565_v39 = vand.u32 2147483647, %v3491_v55  ;;  %vm1561_vm2 = vweird.f32 %v3491_v55 }
 0x1ab   : > { %v1323_v43 = vmin.f32 %v1319_v48, %v1320_v2  ;;  %v1324_v8 = vmin.f32 %v1321_v38, %v1322_v35  ;;  %vm1563_vm3 = vmor %vm1561_vm2, %vm1562_vm1  ;;  %v1568_v44 = vor.u32 1.1754944e-38, %v1567_v61  ;;  %v1555_v18 = vadd.f32 %v1554_v31, %v3502_v26 }
 0x1ac   : > { %v1560_v13 = vadd.f32 %v2120_v3, %v1559_v27  ;;  %vm1566_vm6 = vcmp.eq.f32.partialorder %v1565_v39, 8.507059e+37  ;;  %v1572_v41 = vmul.f32 0.6931472, %v2122_v6  ;;  %v2280_v22 = vmov 1.0|1.0  }
 0x1ad   : > { %v1325_v62 = vmin.f32 %v1323_v43, %v1324_v8 }
 0x1ae   : > { %v1564_v9 = vsel %vm1563_vm3, %v2120_v3, %v1560_v13 }
 0x1af   : > { %v1326_v10 = vrot.slane %v1325_v62, 4  ;;  %v1569_v17 = vsel %vm1566_vm6, %v1568_v44, %v1564_v9 }
 0x1b0   : > { %v1570_v34 = vmul.f32 %v1569_v17, %v1555_v18 }
 0x1b1   : > { %v1327_v42 = vmin.f32 %v1325_v62, %v1326_v10 }
 0x1b2   : > { %v1573_v5 = vsub.f32 %v1570_v34, %v1572_v41 }
 0x1b3   : > { %v1328_v33 = vrot.slane %v1327_v42, 2 }
 0x1b4   : > { %v1574_v55 = vadd.f32 4.8520303, %v1573_v5 }
 0x1b5   : > { %v1329_v59 = vmin.f32 %v1327_v42, %v1328_v33 }
 0x1b6   : > { %1575 = vst [vmem:[%s3740_s26] sm:$0x1] %v1574_v55  ;;  %s1617_s26 = sshll.u32 %s3882_s2, 4  ;;  %s1618_s26 = int_to_ptr.vmem [resolvable:$true] %s1617_s26 }
 0x1b7   : > { %v1330_v29 = vrot.slane %v1329_v59, 1 }
 0x1b9   : > { %v1331_v19 = vmin.f32 %v1329_v59, %v1330_v29 }
 0x1bb   : > { %vm1929_vm4 = vcmp.lt.s32.totalorder %v1331_v19, 0  ;;  %v1930_v26 = vceil.f32 %v1331_v19  ;;  %v1931_v40 = vfloor.f32 %v1331_v19 }
 0x1bd   : > { %v1932_v3 = vsel %vm1929_vm4, %v1930_v26, %v1931_v40 }
 0x1be   : > { %v1933_v15 = vcvt.f32.s32 %v1932_v3 }
 0x1c0   : > { %vm1347_vm7 = vcmp.eq.s32.totalorder %v3877_v4, %v1933_v15  ;;  %vm1348_vm5 = vcmp.eq.s32.totalorder %v3878_v52, %v1933_v15  ;;  %1576 = vst [vmem:[%s3741_s27] sm:$0x1] %v1933_v15  ;;  %vm1345_vm9 = vcmp.eq.s32.totalorder %v3875_v23, %v1933_v15  ;;  %vm1346_vm10 = vcmp.eq.s32.totalorder %v3876_v24, %v1933_v15 }
 0x1c1   : > { %vm1856_vm8 = vmpackc.low %vm1348_vm5, %vm1347_vm7  ;;  %vm1343_vm12 = vcmp.eq.s32.totalorder %v3873_v11, %v1933_v15  ;;  %vm1344_vm13 = vcmp.eq.s32.totalorder %v3874_v58, %v1933_v15  ;;  %vm1341_vm15 = vcmp.eq.s32.totalorder %v3871_v36, %v1933_v15  ;;  %vm1342_vm0 = vcmp.eq.s32.totalorder %v3872_v53, %v1933_v15 }
 0x1c2   : > { %1857 = vmatpush.bf16.msk.msra.mxu1 %vm1856_vm8, %v2280_v22  ;;  %1889 = vmatpush.bf16.msk.msra.mxu2 %vm1856_vm8, %v2280_v22  ;;  %vm1858_vm11 = vmpackc.low %vm1346_vm10, %vm1345_vm9  ;;  %vm1339_vm2 = vcmp.eq.s32.totalorder %v3869_v51, %v1933_v15  ;;  %vm1340_vm3 = vcmp.eq.s32.totalorder %v3870_v50, %v1933_v15  ;;  %vm1337_vm4 = vcmp.eq.s32.totalorder %v3867_v57, %v1933_v15  ;;  %v1923_v57 = vld [vmem:[%s3879_s5] sm:$0xff]  ;;  %v1926_v51 = vld [vmem:[%s3879_s5 + $0x18] sm:$0xff] }
 0x1c3   : > { %vm1860_vm14 = vmpackc.low %vm1344_vm13, %vm1343_vm12  ;;  %vm1338_vm7 = vcmp.eq.s32.totalorder %v3868_v7, %v1933_v15  ;;  %vm1335_vm8 = vcmp.eq.s32.totalorder %v3865_v25, %v1933_v15  ;;  %vm1336_vm9 = vcmp.eq.s32.totalorder %v3866_v32, %v1933_v15  ;;  %vm1334_vm12 = vcmp.eq.s32.totalorder %v3864_v12, %v1933_v15  ;;  %v1919_v7 = vld [vmem:[%s3880_s4] sm:$0xff]  ;;  %v1920_v12 = vld [vmem:[%s3880_s4 + $0x8] sm:$0xff] }
 0x1c4   : > { %vm1862_vm1 = vmpackc.low %vm1342_vm0, %vm1341_vm15  ;;  %v1925_v25 = vld [vmem:[%s3879_s5 + $0x10] sm:$0xff]  ;;  %v1922_v50 = vld [vmem:[%s3880_s4 + $0x18] sm:$0xff] }
 0x1c5   : > { %vm1864_vm6 = vmpackc.low %vm1340_vm3, %vm1339_vm2  ;;  %v1921_v32 = vld [vmem:[%s3880_s4 + $0x10] sm:$0xff] }
 0x1c6   : > { %1859 = vmatpush.bf16.msk.msra.mxu1 %vm1858_vm11, %v2280_v22  ;;  %1891 = vmatpush.bf16.msk.msra.mxu2 %vm1858_vm11, %v2280_v22  ;;  %vm1866_vm5 = vmpackc.low %vm1338_vm7, %vm1337_vm4  ;;  %vm1333_vm11 = vcmp.eq.s32.totalorder %v3863_v0, %v1933_v15  ;;  %v1924_v0 = vld [vmem:[%s3879_s5 + $0x8] sm:$0xff] }
 0x1c7   : > { %vm1868_vm10 = vmpackc.low %vm1336_vm9, %vm1335_vm8 }
 0x1c8   : > { %vm1870_vm13 = vmpackc.low %vm1334_vm12, %vm1333_vm11 }
 0x1ca   : > { %1861 = vmatpush.bf16.msk.msra.mxu1 %vm1860_vm14, %v2280_v22  ;;  %1893 = vmatpush.bf16.msk.msra.mxu2 %vm1860_vm14, %v2280_v22 }
 0x1ce   : > { %1863 = vmatpush.bf16.msk.msra.mxu1 %vm1862_vm1, %v2280_v22  ;;  %1895 = vmatpush.bf16.msk.msra.mxu2 %vm1862_vm1, %v2280_v22 }
 0x1d2   : > { %1865 = vmatpush.bf16.msk.msra.mxu1 %vm1864_vm6, %v2280_v22  ;;  %1897 = vmatpush.bf16.msk.msra.mxu2 %vm1864_vm6, %v2280_v22 }
 0x1d6   : > { %1867 = vmatpush.bf16.msk.msra.mxu1 %vm1866_vm5, %v2280_v22  ;;  %1899 = vmatpush.bf16.msk.msra.mxu2 %vm1866_vm5, %v2280_v22 }
 0x1da   : > { %1869 = vmatpush.bf16.msk.msra.mxu1 %vm1868_vm10, %v2280_v22  ;;  %1901 = vmatpush.bf16.msk.msra.mxu2 %vm1868_vm10, %v2280_v22 }
 0x1de   : > { %1871 = vmatpush.bf16.msk.msra.mxu1 %vm1870_vm13, %v2280_v22  ;;  %1903 = vmatpush.bf16.msk.msra.mxu2 %vm1870_vm13, %v2280_v22 }
 0x1e1   : > { %1437 = vmatmul.bf16.vlgmr.msra.gmra.mxu1 %v1923_v57  ;;  %1490 = vmatmul.bf16.vlgmr.msra.gmra.mxu2 %v1919_v7 }
 0x1f1   : > { %1442 = vmatmul.bf16.gmra.mxu1 %v1924_v0  ;;  %1495 = vmatmul.bf16.gmra.mxu2 %v1920_v12 }
 0x201   : > { %1447 = vmatmul.bf16.gmra.mxu1 %v1925_v25  ;;  %1500 = vmatmul.bf16.gmra.mxu2 %v1921_v32 }
 0x211   : > { %1452 = vmatmul.bf16.gmra.mxu1 %v1926_v51  ;;  %1505 = vmatmul.bf16.gmra.mxu2 %v1922_v50 }
 0x212   : > { %2150 = shalt.err (!%p2147_p7)
}
 0x213   : > { %1935 = dma.vmem_to_hbm [thread:$0]  (%p2396_p8), %s1618_s26, 16, %s1620_s0, %s3742_s17  }
 0x214   : > { %s1630_s4 = scalar_lea.hbm %s3691_s8, %s1614_s22  ;;  %s3883_s23 = scalar_lea.vmem [#allocation9], %s2422_s15 }
 0x215   : > { %s1632_s24 = sshll.u32 %s3883_s23, 4  ;;  %s1634_s5 = sshll.u32 %s1630_s4, 4  ;;  %s1633_s24 = int_to_ptr.vmem [resolvable:$true] %s1632_s24  ;;  %s1635_s5 = int_to_ptr.hbm [resolvable:$true] %s1634_s5 }
 0x216   : > { %s2165_s3 = sshra.s32 %s1635_s5, 4  ;;  %s2171_s26 = scalar_lea.hbm %s3691_s8, 4  ;;  %s2166_s3 = int_to_ptr.hbm [resolvable:$true] %s2165_s3 }
 0x217   : > { %s2167_s19 = scalar_lea.hbm %s2166_s3, 1  ;;  %p2172_p13 = scmp.lt.s32.totalorder %s2166_s3, %s3691_s8 }
 0x218   : > { %p2168_p10 = scmp.ne.s32.totalorder %s2166_s3, %s2167_s19  ;;  %p2173_p0 = scmp.lt.s32.totalorder %s2171_s26, %s2167_s19 }
 0x21a   : > { %p2169_p11 = pnand %p2168_p10, %p2396_p8  ;;  %p2174_p1 = por %p2173_p0, %p2172_p13 }
 0x21c   : > { %p2170_p12 = pneg %p2169_p11 }
 0x21e   : > { %p2175_p2 = pnand %p2174_p1, %p2170_p12 }
 0x220   : > { %2178 = shalt.err (!%p2175_p2)
}
 0x221   : > { %s3884_s22 = scalar_lea.sflag [#allocation8], %s3586_s28  ;;  %s1781_s1 = sshll.u32 %s2422_s15, 6 }
 0x222   : > { %1936 = dma.vmem_to_hbm [thread:$0]  (%p2396_p8), %s1633_s24, 16, %s1635_s5, %s3884_s22  }
 0x223   : > { %s3626_s2 = scalar_lea.vmem [#allocation5], %s1781_s1  ;;  %s1905_s28 = sshll.u32 %s2265_s11, 4 }
 0x224   : > { %s1596_s17 = sadd.s32 %s2261_s10, %s1905_s28  ;;  %s1599_s3 = sshll.u32 %s3626_s2, 4  ;;  %s1600_s3 = int_to_ptr.vmem [resolvable:$true] %s1599_s3 }
 0x225   : > { %s1906_s4 = sshll.u32 %s1596_s17, 3  ;;  %s1578_s11 = scalar_lea.sflag [#allocation6], %s2422_s15 }
 0x226   : > { %s1598_s5 = scalar_lea.hbm %s3689_s6, %s1906_s4  ;;  %s2199_s0 = scalar_lea.hbm %s3689_s6, 256 }
 0x227   : > { %s1601_s19 = sshll.u32 %s1598_s5, 4  ;;  %s1602_s19 = int_to_ptr.hbm [resolvable:$true] %s1601_s19 }
 0x228   : > { %s2193_s10 = sshra.s32 %s1602_s19, 4  ;;  %s2194_s10 = int_to_ptr.hbm [resolvable:$true] %s2193_s10 }
 0x229   : > { %s2195_s18 = scalar_lea.hbm %s2194_s10, 64  ;;  %p2200_p6 = scmp.lt.s32.totalorder %s2194_s10, %s3689_s6 }
 0x22a   : > { %p2196_p3 = scmp.ne.s32.totalorder %s2194_s10, %s2195_s18  ;;  %p2201_p7 = scmp.lt.s32.totalorder %s2199_s0, %s2195_s18 }
 0x22c   : > { %p2197_p4 = pnand %p2196_p3, %p2396_p8  ;;  %p2202_p10 = por %p2201_p7, %p2200_p6 }
 0x22e   : > { %p2198_p5 = pneg %p2197_p4 }
 0x230   : > { %p2203_p11 = pnand %p2202_p10, %p2198_p5 }
 0x25e   : > { %v1438_v36 = vpop.f32.mrf.mxu1 }
 0x264   : > { %v1491_v53 = vpop.f32.mrf.mxu2 }
 0x265   : > { %v1492_v11 = vadd.f32 %v1491_v53, %v1438_v36 }
 0x266   : > { %v1440_v58 = vpop.f32.mrf.mxu1 }
 0x267   : > { %1511 = vst [vmem:[%s3626_s2] sm:$0xff] %v1492_v11 }
 0x26c   : > { %v1493_v23 = vpop.f32.mrf.mxu2 }
 0x26d   : > { %v1494_v24 = vadd.f32 %v1493_v23, %v1440_v58 }
 0x26e   : > { %v1443_v4 = vpop.f32.mrf.mxu1 }
 0x26f   : > { %1512 = vst [vmem:[%s3626_s2 + $0x8] sm:$0xff] %v1494_v24 }
 0x274   : > { %v1496_v52 = vpop.f32.mrf.mxu2 }
 0x275   : > { %v1497_v45 = vadd.f32 %v1496_v52, %v1443_v4 }
 0x276   : > { %v1445_v14 = vpop.f32.mrf.mxu1 }
 0x277   : > { %1513 = vst [vmem:[%s3626_s2 + $0x10] sm:$0xff] %v1497_v45 }
 0x27c   : > { %v1498_v30 = vpop.f32.mrf.mxu2 }
 0x27d   : > { %v1499_v37 = vadd.f32 %v1498_v30, %v1445_v14 }
 0x27e   : > { %v1448_v60 = vpop.f32.mrf.mxu1 }
 0x27f   : > { %1514 = vst [vmem:[%s3626_s2 + $0x18] sm:$0xff] %v1499_v37 }
 0x284   : > { %v1501_v1 = vpop.f32.mrf.mxu2 }
 0x285   : > { %v1502_v47 = vadd.f32 %v1501_v1, %v1448_v60 }
 0x286   : > { %v1450_v46 = vpop.f32.mrf.mxu1 }
 0x287   : > { %1515 = vst [vmem:[%s3626_s2 + $0x20] sm:$0xff] %v1502_v47 }
 0x28c   : > { %v1503_v56 = vpop.f32.mrf.mxu2 }
 0x28d   : > { %v1504_v21 = vadd.f32 %v1503_v56, %v1450_v46 }
 0x28e   : > { %v1453_v49 = vpop.f32.mrf.mxu1 }
 0x28f   : > { %1516 = vst [vmem:[%s3626_s2 + $0x28] sm:$0xff] %v1504_v21 }
 0x294   : > { %v1506_v63 = vpop.f32.mrf.mxu2 }
 0x295   : > { %v1507_v20 = vadd.f32 %v1506_v63, %v1453_v49 }
 0x296   : > { %v1455_v16 = vpop.f32.mrf.mxu1 }
 0x297   : > { %1517 = vst [vmem:[%s3626_s2 + $0x30] sm:$0xff] %v1507_v20 }
 0x29c   : > { %v1508_v28 = vpop.f32.mrf.mxu2 }
 0x29d   : > { %v1509_v54 = vadd.f32 %v1508_v28, %v1455_v16 }
 0x29f   : > { %1518 = vst [vmem:[%s3626_s2 + $0x38] sm:$0xff] %v1509_v54 }
 0x2a0   : > { %2206 = shalt.err (!%p2203_p11)
}
 0x2a1   : > { %s2281_s15 = smov 128   ;;  %s2282_s2 = smov 256  }
 0x2a2   : > { %s2283_s28 = smov 8  }
 0x2a3   : > { %1934 = dma.vmem_to_hbm [thread:$0]  (%p2396_p8), %s1600_s3, 1024, %s1602_s19, %s1578_s11, %s2281_s15, %s2282_s2, %s2283_s28  }
 0x2a4 PF: > { %p1950_p12 = scmp.ge.s32.totalorder %s2277_s14, 2  ;;  %s1646_s17 = sand.u32 1, %s2249_s29  }
 0x2a5   : > { %s1647_s4 = scalar_lea.sflag [#allocation6], %s1646_s17 }
 0x2a6   : > { %p1941_p13 = pnand %p1950_p12, %p2400_p9 }
 0x2a8   : > { %p1942_p0 = pneg %p1941_p13 }
 0x2aa   : > { %2240 = dma.done.wait (%p1942_p0), %s1647_s4, 1024  }
 0x2ab   : > { %2242 = vsyncadd (%p1942_p0), %s1647_s4, 4294966272  ;;  %s3885_s23 = sadd.s32 4294967294, %s2277_s14  }
 0x2ac   : > { %s1656_s24 = sand.u32 1, %s3885_s23  }
 0x2ad   : > { %s1657_s5 = scalar_lea.sflag [#allocation8], %s1656_s24 }
 0x2ae   : > { %2244 = dma.done.wait (%p1942_p0), %s1657_s5, 32  }
 0x2af   : > { %2246 = vsyncadd (%p1942_p0), %s1657_s5, 4294967264  ;;  %s26_s14 = sadd.s32 1, %s2277_s14   ;;  %s3886_s20 = sld [smem:[#allocation12_spill]] }
 0x2b0   : > { %p23_p8 = scmp.ge.s32.totalorder %s26_s14, 6   ;;  %s3887_s29 = smov %s2253_s30 }
 0x2b1   : > { %s3888_s30 = smov %s2257_s9  ;;  %s3889_s9 = smov %s2408_s25 }
 0x2b2   : > { %s3890_s10 = smov %s2269_s12  ;;  %s3891_s11 = smov %s2273_s13 }
 0x2b3   : > { %s3892_s12 = smov %s3895_s16  ;;  %25 = sbr.rel (!%p23_p8) target bundleno = 14 (0xe), region = 150 }
 0x2b5   : > { %s3893_s13 = smov %s3886_s20 }
 0x2b8   :  { %1671 = vsyncpa [#allocation6], 1 }
 0x2b9   :  { %1673 = vsyncpa [#allocation6 + $0x1], 1 }
 0x2ba   :  { %1674 = vsyncpa [#allocation8], 1 }
 0x2bb   :  { %1676 = vsyncpa [#allocation8 + $0x1], 1 }

</bundles_post_ra>
